<compile_context>
chip_gen: v6e
topology: v6e:2x2x1
jax: 0.10.0
libtpu: 0.0.40
codegen_flags: <defaults>
</compile_context>

<pallas_src>
import jax
import jax.numpy as jnp
from jax.experimental import pallas as pl
from jax.experimental.pallas import tpu as pltpu


def _round_up(x, m):
    return (x + m - 1) // m * m


# ----------------------------------------------------------------------------
# Fused kernel: 3x3 conv (stride 1, pad 1) + folded-BN bias + ReLU, one row tile
# ----------------------------------------------------------------------------
def _conv3x3_bn_relu_kernel(xm_ref, xh_ref, w_ref, b_ref, o_ref):
    """
    xm_ref: (1, th, W+2, Cin)   bf16  padded-input rows [i*th, i*th+th)
    xh_ref: (1, 2,  W+2, Cin)   bf16  2-row halo: padded rows [i*th+th, i*th+th+2)
    w_ref : (9, Cin, Coutp)     bf16  BN-folded weights, tap index = 3*dy + dx
    b_ref : (1, Coutp)          f32   BN-folded bias
    o_ref : (1, th, W, Coutp)   bf16
    """
    _, th, wp, cin = xm_ref.shape
    wm = wp - 2
    coutp = o_ref.shape[-1]

    # Build the full (th+2)-row slab ONCE per block (single sublane concat);
    # every tap below is a cheap slice of it.
    slab_full = jnp.concatenate([xm_ref[0], xh_ref[0]], axis=0)   # (th+2, wp, cin)

    # TODO(synk): when Cin < 128 the contraction underfills the MXU; folding the
    # 3 dy taps into K (lane-concat -> 3 matmuls with K=3*Cin) would cut matmul
    # issues and accumulator adds 3x, but the lane-unaligned concat relayout is
    # a lowering risk, so the proven 9-tap structure is kept.
    acc = jnp.zeros((th * wm, coutp), jnp.float32)
    for dx in range(3):
        slab = slab_full[:, dx:dx + wm, :]                # one sublane shift per dx
        for dy in range(3):
            lhs = slab[dy:dy + th].reshape(th * wm, cin)  # major slice + free flatten
            acc = acc + jnp.dot(lhs, w_ref[3 * dy + dx],
                                preferred_element_type=jnp.float32)
    acc = jnp.maximum(acc + b_ref[...], 0.0)
    o_ref[...] = acc.reshape(1, th, wm, coutp).astype(o_ref.dtype)


# ----------------------------------------------------------------------------
# BN folding / weight layout (precompute & cache outside the hot path)
# ----------------------------------------------------------------------------
def fold_bn_into_conv(weight, bias, gamma, beta, running_mean, running_var,
                      *, eps=1e-5, compute_dtype=jnp.bfloat16):
    """Fold inference-mode BatchNorm into the conv; returns kernel operands.

    weight: (Cout, Cin, 3, 3) OIHW;  bias/gamma/beta/mean/var: (Cout,).
    Returns (w_taps (9, Cin, Coutp) bf16, b_pad (1, Coutp) f32), Coutp = 128-multiple.
    """
    # TODO(synk): training-mode BN (batch statistics) would need an extra
    # cross-tile reduction pass; only inference-mode running stats are folded.
    cout, cin, kh, kw = weight.shape
    assert (kh, kw) == (3, 3)
    scale = gamma / jnp.sqrt(running_var + eps)                   # (Cout,)
    w_f = weight * scale[:, None, None, None]                     # OIHW
    b_f = (bias - running_mean) * scale + beta                    # (Cout,)

    coutp = _round_up(max(cout, 128), 128)        # lane-dense unmasked stores
    w_taps = jnp.transpose(w_f, (2, 3, 1, 0)).reshape(9, cin, cout)   # tap = 3*dy+dx
    w_taps = jnp.pad(w_taps, ((0, 0), (0, 0), (0, coutp - cout))).astype(compute_dtype)
    b_pad = jnp.pad(b_f, (0, coutp - cout)).reshape(1, coutp).astype(jnp.float32)
    return w_taps, b_pad


def _pick_row_tile(h, wm, coutp):
    # Collapse as much of H into one grid step as the f32 accumulator allows:
    # acc = (th*wm, coutp) f32 kept <= ~32 vregs (128 KiB) -> M <= 32768/coutp.
    m_budget = max(64, (32 * 1024) // coutp)
    th = min(_round_up(h, 2), max(2, m_budget // wm))
    return max(2, (th // 2) * 2)                  # even (halo half-block indexing)


# ----------------------------------------------------------------------------
# Channels-last entry point (use this when chaining layers: no NCHW round-trips)
# ----------------------------------------------------------------------------
def conv_bn_relu_nhwc(x_nhwc, w_taps, b_pad, cout, *, row_tile=None):
    """x_nhwc: (N, H, W, Cin).  Returns (N, H, W, Cout) in the compute dtype."""
    n, h, w, cin = x_nhwc.shape
    ntaps, cin_w, coutp = w_taps.shape
    assert ntaps == 9 and cin_w == cin and coutp % 128 == 0

    wm = _round_up(w, 8)                          # sublane-aligned interior width
    th = row_tile if row_tile is not None else _pick_row_tile(h, wm, coutp)
    assert th % 2 == 0, "row_tile must be even (halo block indexing)"
    hm = _round_up(h, th)
    wp = wm + 2

    # 1-pixel conv halo + alignment padding.
    # TODO(synk): the pad + final crop are extra HBM passes; a production
    # version would handle image edges inside the kernel (pl.when on edge
    # tiles) and keep the padded layout resident across layers.
    xp = jnp.pad(x_nhwc.astype(w_taps.dtype),
                 ((0, 0), (1, hm - h + 1), (1, wm - w + 1), (0, 0)))
    # xp: (N, hm + 2, wm + 2, Cin)

    grid = (n, hm // th)
    out = pl.pallas_call(
        _conv3x3_bn_relu_kernel,
        out_shape=jax.ShapeDtypeStruct((n, hm, wm, coutp), w_taps.dtype),
        grid=grid,
        in_specs=[
            # main row tile: padded rows [i*th, i*th + th)
            pl.BlockSpec((1, th, wp, cin), lambda b, i: (b, i, 0, 0)),
            # 2-row halo of the SAME padded array: rows [i*th+th, i*th+th+2)
            pl.BlockSpec((1, 2, wp, cin),
                         lambda b, i: (b, (i + 1) * (th // 2), 0, 0)),
            # BN-folded weights / bias stay resident across the whole grid
            pl.BlockSpec((9, cin, coutp), lambda b, i: (0, 0, 0)),
            pl.BlockSpec((1, coutp), lambda b, i: (0, 0)),
        ],
        out_specs=pl.BlockSpec((1, th, wm, coutp), lambda b, i: (b, i, 0, 0)),
        compiler_params=pltpu.CompilerParams(
            dimension_semantics=("parallel", "parallel"),
            vmem_limit_bytes=32 * 1024 * 1024,
        ),
    )(xp, xp, w_taps, b_pad)

    # crop alignment / lane padding (still channels-last, compute dtype)
    return out[:, :h, :w, :cout]


# ----------------------------------------------------------------------------
# PyTorch-facing NCHW ConvBNReLU forward
# ----------------------------------------------------------------------------
def conv_bn_relu(x, weight, bias, gamma, beta, running_mean, running_var,
                 *, eps=1e-5, row_tile=None, compute_dtype=jnp.bfloat16):
    """Forward of ConvBNReLU (ks=3, stride=1, padding=1, dilation=1).

    x: (N, Cin, H, W) f32 NCHW.  Returns (N, Cout, H, W) f32.
    """
    cout = weight.shape[0]
    w_taps, b_pad = fold_bn_into_conv(weight, bias, gamma, beta, running_mean,
                                      running_var, eps=eps,
                                      compute_dtype=compute_dtype)
    x_nhwc = jnp.transpose(x, (0, 2, 3, 1))
    y = conv_bn_relu_nhwc(x_nhwc, w_taps, b_pad, cout, row_tile=row_tile)
    # layout-back pass also casts the bf16 kernel output up to f32
    return jnp.transpose(y, (0, 3, 1, 2)).astype(jnp.float32)


# ----------------------------------------------------------------------------
# Pure-JAX reference (PyTorch op order: conv -> BN -> ReLU), f32
# ----------------------------------------------------------------------------
def conv_bn_relu_reference(x, weight, bias, gamma, beta, running_mean,
                           running_var, eps=1e-5):
    y = jax.lax.conv_general_dilated(
        x, weight, window_strides=(1, 1), padding=((1, 1), (1, 1)),
        dimension_numbers=("NCHW", "OIHW", "NCHW"),
        precision=jax.lax.Precision.HIGHEST)
    y = y + bias[None, :, None, None]
    y = (y - running_mean[None, :, None, None]) * (
        gamma[None, :, None, None]
        / jnp.sqrt(running_var[None, :, None, None] + eps))
    y = y + beta[None, :, None, None]
    return jnp.maximum(y, 0.0)


# ----------------------------------------------------------------------------
if __name__ == "__main__":
    key = jax.random.PRNGKey(0)
    k_x, k_w, k_g, k_b, k_m, k_v = jax.random.split(key, 6)

    N, CIN, COUT, H, W = 2, 64, 48, 16, 16

    x = jax.random.normal(k_x, (N, CIN, H, W), jnp.float32)
    # Conv init mirrors the module: kaiming_normal_(a=1) => std = 1/sqrt(fan_in),
    # conv bias initialized to 0.
    weight = jax.random.normal(k_w, (COUT, CIN, 3, 3), jnp.float32) / jnp.sqrt(9 * CIN)
    bias = jnp.zeros((COUT,), jnp.float32)
    # Non-trivial (as-if-trained) inference-mode BN statistics / affine params.
    gamma = 1.0 + 0.1 * jax.random.normal(k_g, (COUT,), jnp.float32)
    beta = 0.1 * jax.random.normal(k_b, (COUT,), jnp.float32)
    running_mean = 0.1 * jax.random.normal(k_m, (COUT,), jnp.float32)
    running_var = 1.0 + 0.1 * jnp.abs(jax.random.normal(k_v, (COUT,), jnp.float32))

    fwd = jax.jit(conv_bn_relu)
    out = fwd(x, weight, bias, gamma, beta, running_mean, running_var)
    jax.block_until_ready(out)

    assert out.shape == (N, COUT, H, W), out.shape
    assert out.dtype == jnp.float32

    ref = conv_bn_relu_reference(x, weight, bias, gamma, beta,
                                 running_mean, running_var)
    max_err = float(jnp.max(jnp.abs(out - ref)))
    # bf16 activations/weights on the MXU + bf16 output writeback give a
    # ~1e-2-level deviation from the pure-f32 reference.
    assert max_err < 6e-2, f"max abs error vs f32 reference: {max_err}"

    print("KERNEL_OK")
</pallas_src>

<mosaic_0001>
module attributes {stable_mosaic.version = 11 : i64} {
  func.func @_conv3x3_bn_relu_kernel(%arg0: i32, %arg1: i32, %arg2: memref<1x16x18x64xbf16, #tpu.memory_space<vmem>>, %arg3: memref<1x2x18x64xbf16, #tpu.memory_space<vmem>>, %arg4: memref<9x64x128xbf16, #tpu.memory_space<vmem>>, %arg5: memref<1x128xf32, #tpu.memory_space<vmem>>, %arg6: memref<1x16x16x128xbf16, #tpu.memory_space<vmem>>) attributes {dimension_semantics = [#tpu.dimension_semantics<parallel>, #tpu.dimension_semantics<parallel>], iteration_bounds = array<i64: 2, 1>, scalar_prefetch = 0 : i64, scratch_operands = 0 : i64, tpu.core_type = #tpu.core_type<tc>, window_params = [{transform_indices = @transform_0, window_bounds = array<i64: 1, 16, 18, 64>}, {transform_indices = @transform_1, window_bounds = array<i64: 1, 2, 18, 64>}, {pipeline_mode = #tpu.pipeline_mode<synchronous>, transform_indices = @transform_2, window_bounds = array<i64: 9, 64, 128>}, {pipeline_mode = #tpu.pipeline_mode<synchronous>, transform_indices = @transform_3, window_bounds = array<i64: 1, 128>}, {transform_indices = @transform_4, window_bounds = array<i64: 1, 16, 16, 128>}]} {
    %c0 = arith.constant 0 : index
    %c0_0 = arith.constant 0 : index
    %c0_1 = arith.constant 0 : index
    %c0_2 = arith.constant 0 : index
    %0 = vector.load %arg2[%c0, %c0_0, %c0_1, %c0_2] : memref<1x16x18x64xbf16, #tpu.memory_space<vmem>>, vector<1x16x18x64xbf16>
    %1 = vector.shape_cast %0 : vector<1x16x18x64xbf16> to vector<16x18x64xbf16>
    %c0_3 = arith.constant 0 : index
    %c0_4 = arith.constant 0 : index
    %c0_5 = arith.constant 0 : index
    %c0_6 = arith.constant 0 : index
    %2 = vector.load %arg3[%c0_3, %c0_4, %c0_5, %c0_6] : memref<1x2x18x64xbf16, #tpu.memory_space<vmem>>, vector<1x2x18x64xbf16>
    %3 = vector.shape_cast %2 : vector<1x2x18x64xbf16> to vector<2x18x64xbf16>
    %4 = tpu.concatenate %1, %3 in 0 : vector<16x18x64xbf16>, vector<2x18x64xbf16> -> vector<18x18x64xbf16>
    %cst = arith.constant 0.000000e+00 : f32
    %5 = vector.broadcast %cst : f32 to vector<256x128xf32>
    %6 = vector.extract_strided_slice %4 {offsets = [0, 0, 0], sizes = [18, 16, 64], strides = [1, 1, 1]} : vector<18x18x64xbf16> to vector<18x16x64xbf16>
    %7 = vector.extract_strided_slice %6 {offsets = [0, 0, 0], sizes = [16, 16, 64], strides = [1, 1, 1]} : vector<18x16x64xbf16> to vector<16x16x64xbf16>
    %8 = vector.shape_cast %7 : vector<16x16x64xbf16> to vector<256x64xbf16>
    %c0_7 = arith.constant 0 : index
    %c0_8 = arith.constant 0 : index
    %c0_9 = arith.constant 0 : index
    %9 = vector.load %arg4[%c0_7, %c0_8, %c0_9] : memref<9x64x128xbf16, #tpu.memory_space<vmem>>, vector<1x64x128xbf16>
    %10 = vector.shape_cast %9 : vector<1x64x128xbf16> to vector<64x128xbf16>
    %cst_10 = arith.constant dense<0.000000e+00> : vector<256x128xf32>
    %11 = tpu.matmul %8, %10, %cst_10 {dimension_numbers = #tpu.dot_dimension_numbers<[1], [0], [0], [1], [0, 0, 1, 1], [], []>} : vector<256x64xbf16>, vector<64x128xbf16>, vector<256x128xf32> -> vector<256x128xf32>
    %12 = arith.addf %5, %11 : vector<256x128xf32>
    %13 = vector.extract_strided_slice %6 {offsets = [1, 0, 0], sizes = [16, 16, 64], strides = [1, 1, 1]} : vector<18x16x64xbf16> to vector<16x16x64xbf16>
    %14 = vector.shape_cast %13 : vector<16x16x64xbf16> to vector<256x64xbf16>
    %c3 = arith.constant 3 : index
    %c0_11 = arith.constant 0 : index
    %c0_12 = arith.constant 0 : index
    %15 = vector.load %arg4[%c3, %c0_11, %c0_12] : memref<9x64x128xbf16, #tpu.memory_space<vmem>>, vector<1x64x128xbf16>
    %16 = vector.shape_cast %15 : vector<1x64x128xbf16> to vector<64x128xbf16>
    %cst_13 = arith.constant dense<0.000000e+00> : vector<256x128xf32>
    %17 = tpu.matmul %14, %16, %cst_13 {dimension_numbers = #tpu.dot_dimension_numbers<[1], [0], [0], [1], [0, 0, 1, 1], [], []>} : vector<256x64xbf16>, vector<64x128xbf16>, vector<256x128xf32> -> vector<256x128xf32>
    %18 = arith.addf %12, %17 : vector<256x128xf32>
    %19 = vector.extract_strided_slice %6 {offsets = [2, 0, 0], sizes = [16, 16, 64], strides = [1, 1, 1]} : vector<18x16x64xbf16> to vector<16x16x64xbf16>
    %20 = vector.shape_cast %19 : vector<16x16x64xbf16> to vector<256x64xbf16>
    %c6 = arith.constant 6 : index
    %c0_14 = arith.constant 0 : index
    %c0_15 = arith.constant 0 : index
    %21 = vector.load %arg4[%c6, %c0_14, %c0_15] : memref<9x64x128xbf16, #tpu.memory_space<vmem>>, vector<1x64x128xbf16>
    %22 = vector.shape_cast %21 : vector<1x64x128xbf16> to vector<64x128xbf16>
    %cst_16 = arith.constant dense<0.000000e+00> : vector<256x128xf32>
    %23 = tpu.matmul %20, %22, %cst_16 {dimension_numbers = #tpu.dot_dimension_numbers<[1], [0], [0], [1], [0, 0, 1, 1], [], []>} : vector<256x64xbf16>, vector<64x128xbf16>, vector<256x128xf32> -> vector<256x128xf32>
    %24 = arith.addf %18, %23 : vector<256x128xf32>
    %25 = vector.extract_strided_slice %4 {offsets = [0, 1, 0], sizes = [18, 16, 64], strides = [1, 1, 1]} : vector<18x18x64xbf16> to vector<18x16x64xbf16>
    %26 = vector.extract_strided_slice %25 {offsets = [0, 0, 0], sizes = [16, 16, 64], strides = [1, 1, 1]} : vector<18x16x64xbf16> to vector<16x16x64xbf16>
    %27 = vector.shape_cast %26 : vector<16x16x64xbf16> to vector<256x64xbf16>
    %c1 = arith.constant 1 : index
    %c0_17 = arith.constant 0 : index
    %c0_18 = arith.constant 0 : index
    %28 = vector.load %arg4[%c1, %c0_17, %c0_18] : memref<9x64x128xbf16, #tpu.memory_space<vmem>>, vector<1x64x128xbf16>
    %29 = vector.shape_cast %28 : vector<1x64x128xbf16> to vector<64x128xbf16>
    %cst_19 = arith.constant dense<0.000000e+00> : vector<256x128xf32>
    %30 = tpu.matmul %27, %29, %cst_19 {dimension_numbers = #tpu.dot_dimension_numbers<[1], [0], [0], [1], [0, 0, 1, 1], [], []>} : vector<256x64xbf16>, vector<64x128xbf16>, vector<256x128xf32> -> vector<256x128xf32>
    %31 = arith.addf %24, %30 : vector<256x128xf32>
    %32 = vector.extract_strided_slice %25 {offsets = [1, 0, 0], sizes = [16, 16, 64], strides = [1, 1, 1]} : vector<18x16x64xbf16> to vector<16x16x64xbf16>
    %33 = vector.shape_cast %32 : vector<16x16x64xbf16> to vector<256x64xbf16>
    %c4 = arith.constant 4 : index
    %c0_20 = arith.constant 0 : index
    %c0_21 = arith.constant 0 : index
    %34 = vector.load %arg4[%c4, %c0_20, %c0_21] : memref<9x64x128xbf16, #tpu.memory_space<vmem>>, vector<1x64x128xbf16>
    %35 = vector.shape_cast %34 : vector<1x64x128xbf16> to vector<64x128xbf16>
    %cst_22 = arith.constant dense<0.000000e+00> : vector<256x128xf32>
    %36 = tpu.matmul %33, %35, %cst_22 {dimension_numbers = #tpu.dot_dimension_numbers<[1], [0], [0], [1], [0, 0, 1, 1], [], []>} : vector<256x64xbf16>, vector<64x128xbf16>, vector<256x128xf32> -> vector<256x128xf32>
    %37 = arith.addf %31, %36 : vector<256x128xf32>
    %38 = vector.extract_strided_slice %25 {offsets = [2, 0, 0], sizes = [16, 16, 64], strides = [1, 1, 1]} : vector<18x16x64xbf16> to vector<16x16x64xbf16>
    %39 = vector.shape_cast %38 : vector<16x16x64xbf16> to vector<256x64xbf16>
    %c7 = arith.constant 7 : index
    %c0_23 = arith.constant 0 : index
    %c0_24 = arith.constant 0 : index
    %40 = vector.load %arg4[%c7, %c0_23, %c0_24] : memref<9x64x128xbf16, #tpu.memory_space<vmem>>, vector<1x64x128xbf16>
    %41 = vector.shape_cast %40 : vector<1x64x128xbf16> to vector<64x128xbf16>
    %cst_25 = arith.constant dense<0.000000e+00> : vector<256x128xf32>
    %42 = tpu.matmul %39, %41, %cst_25 {dimension_numbers = #tpu.dot_dimension_numbers<[1], [0], [0], [1], [0, 0, 1, 1], [], []>} : vector<256x64xbf16>, vector<64x128xbf16>, vector<256x128xf32> -> vector<256x128xf32>
    %43 = arith.addf %37, %42 : vector<256x128xf32>
    %44 = vector.extract_strided_slice %4 {offsets = [0, 2, 0], sizes = [18, 16, 64], strides = [1, 1, 1]} : vector<18x18x64xbf16> to vector<18x16x64xbf16>
    %45 = vector.extract_strided_slice %44 {offsets = [0, 0, 0], sizes = [16, 16, 64], strides = [1, 1, 1]} : vector<18x16x64xbf16> to vector<16x16x64xbf16>
    %46 = vector.shape_cast %45 : vector<16x16x64xbf16> to vector<256x64xbf16>
    %c2 = arith.constant 2 : index
    %c0_26 = arith.constant 0 : index
    %c0_27 = arith.constant 0 : index
    %47 = vector.load %arg4[%c2, %c0_26, %c0_27] : memref<9x64x128xbf16, #tpu.memory_space<vmem>>, vector<1x64x128xbf16>
    %48 = vector.shape_cast %47 : vector<1x64x128xbf16> to vector<64x128xbf16>
    %cst_28 = arith.constant dense<0.000000e+00> : vector<256x128xf32>
    %49 = tpu.matmul %46, %48, %cst_28 {dimension_numbers = #tpu.dot_dimension_numbers<[1], [0], [0], [1], [0, 0, 1, 1], [], []>} : vector<256x64xbf16>, vector<64x128xbf16>, vector<256x128xf32> -> vector<256x128xf32>
    %50 = arith.addf %43, %49 : vector<256x128xf32>
    %51 = vector.extract_strided_slice %44 {offsets = [1, 0, 0], sizes = [16, 16, 64], strides = [1, 1, 1]} : vector<18x16x64xbf16> to vector<16x16x64xbf16>
    %52 = vector.shape_cast %51 : vector<16x16x64xbf16> to vector<256x64xbf16>
    %c5 = arith.constant 5 : index
    %c0_29 = arith.constant 0 : index
    %c0_30 = arith.constant 0 : index
    %53 = vector.load %arg4[%c5, %c0_29, %c0_30] : memref<9x64x128xbf16, #tpu.memory_space<vmem>>, vector<1x64x128xbf16>
    %54 = vector.shape_cast %53 : vector<1x64x128xbf16> to vector<64x128xbf16>
    %cst_31 = arith.constant dense<0.000000e+00> : vector<256x128xf32>
    %55 = tpu.matmul %52, %54, %cst_31 {dimension_numbers = #tpu.dot_dimension_numbers<[1], [0], [0], [1], [0, 0, 1, 1], [], []>} : vector<256x64xbf16>, vector<64x128xbf16>, vector<256x128xf32> -> vector<256x128xf32>
    %56 = arith.addf %50, %55 : vector<256x128xf32>
    %57 = vector.extract_strided_slice %44 {offsets = [2, 0, 0], sizes = [16, 16, 64], strides = [1, 1, 1]} : vector<18x16x64xbf16> to vector<16x16x64xbf16>
    %58 = vector.shape_cast %57 : vector<16x16x64xbf16> to vector<256x64xbf16>
    %c8 = arith.constant 8 : index
    %c0_32 = arith.constant 0 : index
    %c0_33 = arith.constant 0 : index
    %59 = vector.load %arg4[%c8, %c0_32, %c0_33] : memref<9x64x128xbf16, #tpu.memory_space<vmem>>, vector<1x64x128xbf16>
    %60 = vector.shape_cast %59 : vector<1x64x128xbf16> to vector<64x128xbf16>
    %cst_34 = arith.constant dense<0.000000e+00> : vector<256x128xf32>
    %61 = tpu.matmul %58, %60, %cst_34 {dimension_numbers = #tpu.dot_dimension_numbers<[1], [0], [0], [1], [0, 0, 1, 1], [], []>} : vector<256x64xbf16>, vector<64x128xbf16>, vector<256x128xf32> -> vector<256x128xf32>
    %62 = arith.addf %56, %61 : vector<256x128xf32>
    %c0_35 = arith.constant 0 : index
    %c0_36 = arith.constant 0 : index
    %63 = vector.load %arg5[%c0_35, %c0_36] : memref<1x128xf32, #tpu.memory_space<vmem>>, vector<1x128xf32>
    %64 = vector.broadcast %63 : vector<1x128xf32> to vector<256x128xf32>
    %65 = arith.addf %62, %64 : vector<256x128xf32>
    %cst_37 = arith.constant 0.000000e+00 : f32
    %66 = vector.broadcast %cst_37 : f32 to vector<256x128xf32>
    %67 = arith.maximumf %65, %66 : vector<256x128xf32>
    %68 = vector.shape_cast %67 : vector<256x128xf32> to vector<1x16x16x128xf32>
    %69 = arith.truncf %68 : vector<1x16x16x128xf32> to vector<1x16x16x128xbf16>
    %c0_38 = arith.constant 0 : index
    %c0_39 = arith.constant 0 : index
    %c0_40 = arith.constant 0 : index
    %c0_41 = arith.constant 0 : index
    %70 = vector.load %arg6[%c0_38, %c0_39, %c0_40, %c0_41] : memref<1x16x16x128xbf16, #tpu.memory_space<vmem>>, vector<1x16x16x128xbf16>
    tpu.vector_store %arg6[%c0_38, %c0_39, %c0_40, %c0_41], %69 {strides = array<i32>} : memref<1x16x16x128xbf16, #tpu.memory_space<vmem>>, vector<1x16x16x128xbf16>,
    return
  }
  func.func @transform_0(%arg0: i32, %arg1: i32) -> (i32, i32, i32, i32) {
    %c0_i32 = arith.constant 0 : i32
    %c0_i32_0 = arith.constant 0 : i32
    %c0_i32_1 = arith.constant 0 : i32
    return %arg0, %arg1, %c0_i32, %c0_i32_0 : i32, i32, i32, i32
  }
  func.func @transform_1(%arg0: i32, %arg1: i32) -> (i32, i32, i32, i32) {
    %c1_i32 = arith.constant 1 : i32
    %0 = arith.addi %arg1, %c1_i32 : i32
    %c8_i32 = arith.constant 8 : i32
    %1 = arith.muli %0, %c8_i32 : i32
    %c0_i32 = arith.constant 0 : i32
    %c0_i32_0 = arith.constant 0 : i32
    %c0_i32_1 = arith.constant 0 : i32
    return %arg0, %1, %c0_i32, %c0_i32_0 : i32, i32, i32, i32
  }
  func.func @transform_2(%arg0: i32, %arg1: i32) -> (i32, i32, i32) {
    %c0_i32 = arith.constant 0 : i32
    %c0_i32_0 = arith.constant 0 : i32
    %c0_i32_1 = arith.constant 0 : i32
    %c0_i32_2 = arith.constant 0 : i32
    return %c0_i32, %c0_i32_0, %c0_i32_1 : i32, i32, i32
  }
  func.func @transform_3(%arg0: i32, %arg1: i32) -> (i32, i32) {
    %c0_i32 = arith.constant 0 : i32
    %c0_i32_0 = arith.constant 0 : i32
    %c0_i32_1 = arith.constant 0 : i32
    return %c0_i32, %c0_i32_0 : i32, i32
  }
  func.func @transform_4(%arg0: i32, %arg1: i32) -> (i32, i32, i32, i32) {
    %c0_i32 = arith.constant 0 : i32
    %c0_i32_0 = arith.constant 0 : i32
    %c0_i32_1 = arith.constant 0 : i32
    return %arg0, %arg1, %c0_i32, %c0_i32_0 : i32, i32, i32, i32
  }
}

</mosaic_0001>

<bundles_post_ra>
// kernel: conv_bn_relu.1
= control target key start
LH: loop header
LB: loop body
LE: loop exit
PB: predicated region body
PF: predicated region fallthrough
CT: control target
= control target key end

     0   :  { %s4831_s15 = smov 0   ;;  %s4833_s16 = smov 0   ;;  %s6442_s0 = inlined_call_operand.vmem [shape: bf16[2,18,18,64], index: 0, kind: input, shape index: {}, may-alias: {0,1}]   ;;  %s6443_s1 = inlined_call_operand.vmem [shape: bf16[2,18,18,64], index: 1, kind: input, shape index: {}, may-alias: {0,1}]   ;;  %s6444_s2 = inlined_call_operand.vmem [shape: bf16[9,64,128], index: 2, kind: input, shape index: {}]   ;;  %s6445_s3 = inlined_call_operand.vmem [shape: f32[1,128], index: 3, kind: input, shape index: {}]   ;;  %s6446_s4 = inlined_call_operand.vmem [shape: bf16[2,16,16,128], index: 4, kind: output, shape index: {}]  }
   0x1   :  { %s4835_s17 = smov 0  }
   0x2 LB: > { %s26_s18 = sadd.s32 1, %s4800_s16  ;;  %p3639_p0 = scmp.ge.s32.totalorder %s4804_s17, 1  ;;  %s4804_s17 = sphi %s4835_s17, %s14_s17   ;;  %s4800_s16 = sphi %s4833_s16, %s6519_s16   ;;  %s4796_s15 = sphi %s4831_s15, %s6518_s15  }
   0x3   : > { %p28_p1 = scmp.ge.s32.totalorder %s26_s18, 2  ;;  %p220_p2 = scmp.lt.s32.totalorder %s4804_s17, 3 }
   0x5   : > { %s6521_s18 = smov (%p28_p1, %s26_s18), 0  ;;  %p221_p3 = pnand %p3639_p0, %p220_p2 }
   0x7   : > { %224 = sbr.rel (%p221_p3) target bundleno = 519 (0x207), region = 36 }
   0xc   : > { %v4700_v0 = vld [vmem:[%s6444_s2 + $0x78] sm:$0xff]   ;;  %p279_p4 = scmp.lt.s32.totalorder %s4796_s15, 1  ;;  %v4701_v1 = vld [vmem:[%s6444_s2 + $0x70] sm:$0xff]   ;;  %v4702_v2 = vld [vmem:[%s6444_s2 + $0x68] sm:$0xff]   ;;  %vm2370_vm0 = vcmask 1042432   ;;  %vm2371_vm1 = vcmask 1046532  }
   0xd   : > { %4305 = vmatprep.subr.bf16.mxu0 %v4700_v0  ;;  %4665 = vmatprep.subr.bf16.mxu1 %v4700_v0  ;;  %vm496_vm2 = vcmask 523264   ;;  %v4703_v6 = vld [vmem:[%s6444_s2 + $0x60] sm:$0xff]   ;;  %vm4884_vm3 = vmor %vm2370_vm0, %vm2371_vm1  ;;  %v4708_v16 = vld [vmem:[%s6444_s2 + $0x18] sm:$0xff]   ;;  %vm1133_vm4 = vsmask.f32 3328 }
   0xe   : > { %s6523_s15 = smov (!%p279_p4, %s4796_s15), 1  ;;  %4306 = vmatpush3.bf16.msra.mxu0 %v4700_v0  ;;  %4669 = vmatpush3.bf16.msra.mxu1 %v4700_v0  ;;  %v4709_v17 = vld [vmem:[%s6444_s2 + $0xd8] sm:$0xff]   ;;  %v4714_v26 = vld [vmem:[%s6444_s2 + $0x10] sm:$0xff]   ;;  %v4720_v30 = vld [vmem:[%s6444_s2 + $0x8] sm:$0xff]   ;;  %vm1134_vm5 = vsmask.f32 7440 }
   0xf   : > { %4307 = vmatprep.subr.bf16.mxu0 %v4701_v1  ;;  %4666 = vmatprep.subr.bf16.mxu1 %v4701_v1  ;;  %s4673_s25 = smul.u32 216, %s6523_s15  ;;  %v4715_v27 = vld [vmem:[%s6444_s2 + $0xd0] sm:$0xff]   ;;  %v4721_v35 = vld [vmem:[%s6444_s2 + $0xc8] sm:$0xff]   ;;  %v4726_v44 = vld [vmem:[%s6444_s2] sm:$0xff]   ;;  %s3997_s12 = sshll.u32 %s6523_s15, 7 }
  0x10   : > { %v4727_v45 = vld [vmem:[%s6444_s2 + $0xc0] sm:$0xff]   ;;  %v4729_v51 = vld [vmem:[%s6444_s2 + $0x38] sm:$0xff]   ;;  %vm5130_vm6 = vmor %vm1133_vm4, %vm1134_vm5  ;;  %s6339_s15 = scalar_lea.vmem %s6446_s4, %s3997_s12 }
  0x11   : > { %s4866_s28 = scalar_lea.vmem %s6442_s0, %s4673_s25  ;;  %s3996_s26 = sadd.s32 192, %s4673_s25  ;;  %v4730_v53 = vld [vmem:[%s6444_s2 + $0x98] sm:$0xff]  }
  0x12   : > { %4308 = vmatpush3.bf16.msra.mxu0 %v4701_v1  ;;  %4670 = vmatpush3.bf16.msra.mxu1 %v4701_v1  ;;  %v4869_v3 = vld [vmem:[%s4866_s28 + $0xc] sm:$0xf]  ;;  %v4872_v4 = vld [vmem:[%s4866_s28 + $0x10] sm:$0xf]  ;;  %v4906_v14 = vld [vmem:[%s4866_s28 + $0x18] sm:$0xf]  ;;  %s5076_s7 = scalar_lea.vmem %s6443_s1, %s3996_s26 }
  0x13   : > { %v4875_v5 = vld [vmem:[%s4866_s28 + $0x6c] sm:$0xf]  ;;  %4309 = vmatprep.subr.bf16.mxu0 %v4702_v2  ;;  %4667 = vmatprep.subr.bf16.mxu1 %v4702_v2  ;;  %v4882_v7 = vcombine.low %v4869_v3, %v4872_v4  ;;  %v4889_v9 = vld [vmem:[%s4866_s28 + $0x70] sm:$0xf]  ;;  %v3841_v10 = vrot.slane %v4869_v3, 9  ;;  %v2382_v11 = vrot.slane %v4872_v4, 5 }
  0x14   : > { %v4895_v12 = vcombine.low %v4875_v5, %v4889_v9  ;;  %v4909_v15 = vld [vmem:[%s4866_s28 + $0x1c] sm:$0xf]  ;;  %v4920_v18 = vld [vmem:[%s4866_s28 + $0x78] sm:$0xf]  ;;  %v4930_v21 = vld [vmem:[%s4866_s28 + $0x24] sm:$0xf] }
  0x15   : > { %4313 = vmatprep.mubr.msk.bf16.mxu0 %vm496_vm2, %v4882_v7  ;;  %v4903_v13 = vsel %vm4884_vm3, %v3841_v10, %v2382_v11  ;;  %v4923_v19 = vld [vmem:[%s4866_s28 + $0x7c] sm:$0xf]  ;;  %v4927_v20 = vcombine.low %v4906_v14, %v4909_v15  ;;  %v4933_v22 = vld [vmem:[%s4866_s28 + $0x28] sm:$0xf]  ;;  %v4940_v24 = vld [vmem:[%s4866_s28 + $0x84] sm:$0xf] }
  0x16   : > { %4310 = vmatpush3.bf16.msra.mxu0 %v4702_v2  ;;  %4671 = vmatpush3.bf16.msra.mxu1 %v4702_v2  ;;  %v4937_v23 = vcombine.low %v4920_v18, %v4923_v19  ;;  %v4943_v25 = vld [vmem:[%s4866_s28 + $0x88] sm:$0xf]  ;;  %v4957_v28 = vcombine.low %v4930_v21, %v4933_v22  ;;  %v4960_v29 = vld [vmem:[%s4866_s28 + $0x30] sm:$0xf]  ;;  %v4970_v32 = vld [vmem:[%s4866_s28 + $0x34] sm:$0xf] }
  0x17   : > { %4311 = vmatprep.subr.bf16.mxu0 %v4703_v6  ;;  %4668 = vmatprep.subr.bf16.mxu1 %v4703_v6  ;;  %v4967_v31 = vcombine.low %v4940_v24, %v4943_v25  ;;  %v4973_v33 = vld [vmem:[%s4866_s28 + $0x90] sm:$0xf]  ;;  %v4976_v34 = vld [vmem:[%s4866_s28 + $0x94] sm:$0xf]  ;;  %v4987_v36 = vcombine.low %v4960_v29, %v4970_v32  ;;  %v4994_v38 = vld [vmem:[%s4866_s28 + $0x3c] sm:$0xf] }
  0x18   : > { %4329 = vmatprep.mubr.msk.bf16.mxu1 %vm496_vm2, %v4895_v12  ;;  %v4991_v37 = vcombine.low %v4973_v33, %v4976_v34  ;;  %v4997_v39 = vld [vmem:[%s4866_s28 + $0x40] sm:$0xf]  ;;  %v5004_v41 = vld [vmem:[%s4866_s28 + $0x9c] sm:$0xf]  ;;  %v1161_v46 = vshrl.u32 %v4869_v3, 16  ;;  %v1164_v52 = vshll.u32 %v4869_v3, 16 }
  0x19   : > { %v5001_v40 = vcombine.low %v4994_v38, %v4997_v39  ;;  %v5007_v42 = vld [vmem:[%s4866_s28 + $0xa0] sm:$0xf]  ;;  %v5025_v47 = vld [vmem:[%s4866_s28 + $0x48] sm:$0xf]  ;;  %v5034_v48 = vld [vmem:[%s4866_s28 + $0x4c] sm:$0xf] }
  0x1a   : > { %4312 = vmatpush3.bf16.msra.mxu0 %v4703_v6  ;;  %4672 = vmatpush3.bf16.msra.mxu1 %v4703_v6  ;;  %6465 = vst [vmem:[#allocation2_spill] sm:$0xff] %v5007_v42  ;;  %v5011_v43 = vcombine.low %v5004_v41, %v5007_v42  ;;  %v5037_v49 = vld [vmem:[%s4866_s28 + $0xa8] sm:$0xf]  ;;  %v5040_v50 = vld [vmem:[%s4866_s28 + $0xac] sm:$0xf]  ;;  %v5054_v55 = vcombine.low %v5025_v47, %v5034_v48  ;;  %v1163_v62 = vrot.slane %v1161_v46, 4 }
  0x1b   : > { %4345 = vmatprep.subr.bf16.mxu1 %v4708_v16  ;;  %4385 = vmatprep.subr.bf16.mxu0 %v4709_v17  ;;  %6466 = vst [vmem:[#allocation3_spill] sm:$0xff] %v5037_v49  ;;  %6467 = vst [vmem:[#allocation4_spill] sm:$0xff] %v5040_v50  ;;  %v5050_v54 = vld [vmem:[%s4866_s28 + $0x54] sm:$0xf]  ;;  %v5058_v56 = vcombine.low %v5037_v49, %v5040_v50  ;;  %v5061_v57 = vld [vmem:[%s4866_s28 + $0x58] sm:$0xf] }
  0x1c   : > { %v5064_v58 = vld [vmem:[%s4866_s28 + $0xb4] sm:$0xf]  ;;  %v5068_v59 = vcombine.low %v5050_v54, %v5061_v57  ;;  %v5071_v60 = vld [vmem:[%s4866_s28 + $0xb8] sm:$0xf]  ;;  %v1166_v63 = vrot.slane %v1164_v52, 5  ;;  %v1170_v0 = vshll.u32 %v4872_v4, 16 }
  0x1d   : > { %4314 = vmatmul.mubr.msk.bf16.vlgmr.msra.gmra.mxu0 %vm496_vm2, %v4927_v20  ;;  %4330 = vmatmul.mubr.msk.bf16.vlgmr.msra.gmra.mxu1 %vm496_vm2, %v4937_v23  ;;  %6468 = vst [vmem:[#allocation5_spill] sm:$0xff] %v5064_v58  ;;  %6469 = vst [vmem:[#allocation6_spill] sm:$0xff] %v5071_v60  ;;  %v5080_v61 = vcombine.low %v5064_v58, %v5071_v60  ;;  %v1174_v1 = vshrl.u32 %v4872_v4, 16  ;;  %v5085_v2 = vld [vmem:[%s4866_s28 + $0x60] sm:$0xf]  ;;  %v4732_v4 = vld [vmem:[%s6444_s2 + $0x90] sm:$0xff]  }
  0x1e   : > { %4346 = vmatpush3.bf16.msra.mxu1 %v4708_v16  ;;  %4386 = vmatpush3.bf16.msra.mxu0 %v4709_v17  ;;  %v5092_v3 = vld [vmem:[%s4866_s28 + $0x64] sm:$0xf]  ;;  %v5095_v6 = vld [vmem:[%s5076_s7] sm:$0xf]  ;;  %v1270_v60 = vshrl.u32 %v4997_v39, 16 }
  0x1f   : > { %4317 = vmatprep.mubr.msk.bf16.mxu0 %vm496_vm2, %v4957_v28  ;;  %4347 = vmatprep.subr.bf16.mxu1 %v4714_v26  ;;  %6470 = vst [vmem:[#allocation7_spill] sm:$0xff] %v5095_v6  ;;  %v5102_v10 = vld [vmem:[%s5076_s7 + $0x4] sm:$0xf]  ;;  %v5105_v16 = vld [vmem:[%s4866_s28] sm:$0xf] }
  0x20   : > { %4333 = vmatprep.mubr.msk.bf16.mxu1 %vm496_vm2, %v4967_v31  ;;  %4387 = vmatprep.subr.bf16.mxu0 %v4715_v27  ;;  %6471 = vst [vmem:[#allocation8_spill] sm:$0xff] %v5102_v10  ;;  %v5108_v17 = vld [vmem:[%s4866_s28 + $0x4] sm:$0xf] }
  0x22   : > { %4348 = vmatpush3.bf16.msra.mxu1 %v4714_v26  ;;  %4388 = vmatpush3.bf16.msra.mxu0 %v4715_v27  ;;  %v1172_v26 = vrot.slane %v1170_v0, 5  ;;  %v1176_v27 = vrot.slane %v1174_v1, 4  ;;  %v326_v0 = vld [vmem:[%s4866_s28 + $0x14] sm:$0x1] }
  0x23   : > { %4349 = vmatprep.subr.bf16.mxu1 %v4720_v30  ;;  %4389 = vmatprep.subr.bf16.mxu0 %v4721_v35 }
  0x24   : > { %v1177_v46 = vor.u32 %v1176_v27, %v1172_v26 }
  0x25   : > { %4318 = vmatmul.mubr.msk.bf16.gmra.mxu0 %vm496_vm2, %v4987_v36  ;;  %4334 = vmatmul.mubr.msk.bf16.gmra.mxu1 %vm496_vm2, %v4991_v37 }
  0x26   : > { %4321 = vmatprep.mubr.msk.bf16.mxu0 %vm496_vm2, %v5001_v40  ;;  %4337 = vmatprep.mubr.msk.bf16.mxu1 %vm496_vm2, %v5011_v43 }
  0x27   : > { %4350 = vmatpush3.bf16.msra.mxu1 %v4720_v30  ;;  %4390 = vmatpush3.bf16.msra.mxu0 %v4721_v35  ;;  %v5112_v30 = vcombine.low %v5085_v2, %v5092_v3  ;;  %v5116_v35 = vcombine.low %v5095_v6, %v5102_v10  ;;  %v2385_v10 = vrot.slane %v326_v0, 5  ;;  %v5279_v6 = vld [vmem:[%s4866_s28 + $0x2c] sm:$0x1] }
  0x28   : > { %4351 = vmatprep.subr.bf16.mxu1 %v4726_v44  ;;  %4391 = vmatprep.subr.bf16.mxu0 %v4727_v45  ;;  %v1228_v42 = vshll.u32 %v5279_v6, 16 }
  0x2b   : > { %4352 = vmatpush3.bf16.msra.mxu1 %v4726_v44  ;;  %4392 = vmatpush3.bf16.msra.mxu0 %v4727_v45  ;;  %v1167_v44 = vor.u32 %v1166_v63, %v1163_v62  ;;  %v3688_v45 = vcombine.low %v5105_v16, %v5108_v17  ;;  %v2384_v62 = vrot.slane %v2382_v11, 4  ;;  %v1178_v63 = vrot.slane %v1177_v46, 4 }
  0x2c   : > { %4425 = vmatprep.subr.bf16.mxu1 %v4729_v51  ;;  %4465 = vmatprep.subr.bf16.mxu0 %v4730_v53 }
  0x2d   : > { %4322 = vmatmul.mubr.msk.bf16.gmra.mxu0 %vm496_vm2, %v5054_v55  ;;  %4338 = vmatmul.mubr.msk.bf16.gmra.mxu1 %vm496_vm2, %v5058_v56  ;;  %v1168_v52 = vrot.slane %v1167_v44, 4  ;;  %v1180_v44 = vshll.u32 %v326_v0, 16  ;;  %v5144_v46 = vsel %vm4884_vm3, %v2384_v62, %v2385_v10  ;;  %v4736_v0 = vld [vmem:[%s6444_s2 + $0x80] sm:$0xff]   ;;  %v1362_v62 = vshll.u32 %v4889_v9, 16 }
  0x2e   : > { %4325 = vmatprep.mubr.msk.bf16.mxu0 %vm496_vm2, %v5068_v59  ;;  %4341 = vmatprep.mubr.msk.bf16.mxu1 %vm496_vm2, %v5080_v61 }
  0x2f   : > { %v1173_v27 = vsel %vm5130_vm6, %v1168_v52, %v1172_v26  ;;  %v1182_v11 = vrot.slane %v1180_v44, 5  ;;  %v4733_v26 = vld [vmem:[%s6444_s2 + $0x28] sm:$0xff]  }
  0x31   : > { %v1183_v52 = vsel %vm5130_vm6, %v1178_v63, %v1182_v11  ;;  %v1366_v63 = vshrl.u32 %v4889_v9, 16 }
  0x32   : > { %v5162_v10 = vcombine.low %v1173_v27, %v1183_v52  ;;  %v5203_v52 = vld [vmem:[%s4866_s28 + $0x74] sm:$0x1] }
  0x35   : > { %4326 = vmatmul.mubr.msk.bf16.gmra.mxu0 %vm496_vm2, %v5112_v30  ;;  %4342 = vmatmul.mubr.msk.bf16.gmra.mxu1 %vm496_vm2, %v5116_v35 }
  0x36   : > { %4353 = vmatprep.mubr.msk.bf16.mxu1 %vm496_vm2, %v3688_v45  ;;  %4393 = vmatprep.mubr.msk.bf16.mxu0 %vm496_vm2, %v4927_v20  ;;  %v4731_v45 = vld [vmem:[%s6444_s2 + $0x30] sm:$0xff]  }
  0x3d   : > { %4354 = vmatmul.mubr.msk.bf16.vlgmr.msra.gmra.mxu1 %vm496_vm2, %v4882_v7  ;;  %4394 = vmatmul.mubr.msk.bf16.vlgmr.msra.gmra.mxu0 %vm496_vm2, %v4957_v28  ;;  %v4734_v7 = vld [vmem:[%s6444_s2 + $0x88] sm:$0xff]  }
  0x3e   : > { %4426 = vmatpush3.bf16.msra.mxu1 %v4729_v51  ;;  %4466 = vmatpush3.bf16.msra.mxu0 %v4730_v53  ;;  %v1353_v51 = vshrl.u32 %v4875_v5, 16  ;;  %v1356_v53 = vshll.u32 %v4875_v5, 16 }
  0x3f   : > { %4357 = vmatprep.mubr.msk.bf16.mxu1 %vm496_vm2, %v4927_v20  ;;  %4397 = vmatprep.mubr.msk.bf16.mxu0 %vm496_vm2, %v4987_v36  ;;  %v4735_v20 = vld [vmem:[%s6444_s2 + $0x20] sm:$0xff]  }
  0x40   : > { %4427 = vmatprep.subr.bf16.mxu1 %v4731_v45  ;;  %4467 = vmatprep.subr.bf16.mxu0 %v4732_v4  ;;  %v1355_v27 = vrot.slane %v1353_v51, 4  ;;  %v1358_v44 = vrot.slane %v1356_v53, 5 }
  0x42   : > { %4428 = vmatpush3.bf16.msra.mxu1 %v4731_v45  ;;  %4468 = vmatpush3.bf16.msra.mxu0 %v4732_v4  ;;  %v1364_v45 = vrot.slane %v1362_v62, 5  ;;  %v1368_v4 = vrot.slane %v1366_v63, 4  ;;  %v1359_v11 = vor.u32 %v1358_v44, %v1355_v27  ;;  %v1185_v62 = vshrl.u32 %v4906_v14, 16 }
  0x43   : > { %4429 = vmatprep.subr.bf16.mxu1 %v4733_v26  ;;  %4469 = vmatprep.subr.bf16.mxu0 %v4734_v7  ;;  %v1188_v63 = vshll.u32 %v4906_v14, 16  ;;  %v1198_v27 = vshrl.u32 %v4909_v15, 16  ;;  %v1137_v44 = vshrl.u32 %v5105_v16, 16  ;;  %v1150_v14 = vshrl.u32 %v5108_v17, 16 }
  0x45   : > { %4358 = vmatmul.mubr.msk.bf16.gmra.mxu1 %vm496_vm2, %v4957_v28  ;;  %4398 = vmatmul.mubr.msk.bf16.gmra.mxu0 %vm496_vm2, %v5001_v40  ;;  %v5185_v28 = vld [vmem:[%s6444_s2 + $0xf8] sm:$0xff]  }
  0x46   : > { %4361 = vmatprep.mubr.msk.bf16.mxu1 %vm496_vm2, %v4987_v36  ;;  %4401 = vmatprep.mubr.msk.bf16.mxu0 %vm496_vm2, %v5054_v55  ;;  %v5190_v36 = vld [vmem:[%s6444_s2 + $0x58] sm:$0xff]  }
  0x47   : > { %4430 = vmatpush3.bf16.msra.mxu1 %v4733_v26  ;;  %4470 = vmatpush3.bf16.msra.mxu0 %v4734_v7  ;;  %v1369_v26 = vor.u32 %v1368_v4, %v1364_v45  ;;  %v1360_v7 = vrot.slane %v1359_v11, 4  ;;  %v1190_v4 = vrot.slane %v1188_v63, 5 }
  0x48   : > { %4431 = vmatprep.subr.bf16.mxu1 %v4735_v20  ;;  %4471 = vmatprep.subr.bf16.mxu0 %v4736_v0 }
  0x49   : > { %v1365_v51 = vsel %vm5130_vm6, %v1360_v7, %v1364_v45  ;;  %v1370_v53 = vrot.slane %v1369_v26, 4  ;;  %v1187_v45 = vrot.slane %v1185_v62, 4  ;;  %v1200_v26 = vrot.slane %v1198_v27, 4  ;;  %v5248_v27 = vld [vmem:[%s4866_s28 + $0x20] sm:$0x1] }
  0x4a   : > { %v1139_v7 = vrot.slane %v1137_v44, 4  ;;  %6475 = vst [vmem:[#allocation10_spill] sm:$0xff] %v5248_v27 }
  0x4b   : > { %4432 = vmatpush3.bf16.msra.mxu1 %v4735_v20  ;;  %4472 = vmatpush3.bf16.msra.mxu0 %v4736_v0  ;;  %v1372_v20 = vshll.u32 %v5203_v52, 16 }
  0x4c   : > { %4505 = vmatprep.subr.bf16.mxu1 %v5185_v28  ;;  %4545 = vmatprep.subr.bf16.mxu0 %v5190_v36 }
  0x4d   : > { %4362 = vmatmul.mubr.msk.bf16.gmra.mxu1 %vm496_vm2, %v5001_v40  ;;  %4402 = vmatmul.mubr.msk.bf16.gmra.mxu0 %vm496_vm2, %v5068_v59  ;;  %v1374_v40 = vrot.slane %v1372_v20, 5  ;;  %v1212_v20 = vshll.u32 %v4930_v21, 16 }
  0x4e   : > { %4365 = vmatprep.mubr.msk.bf16.mxu1 %vm496_vm2, %v5054_v55  ;;  %4405 = vmatprep.mubr.msk.bf16.mxu0 %vm496_vm2, %v5112_v30 }
  0x4f   : > { %v1375_v55 = vsel %vm5130_vm6, %v1370_v53, %v1374_v40  ;;  %v1209_v53 = vshrl.u32 %v4930_v21, 16  ;;  %v5241_v40 = vld [vmem:[%s4866_s28 + $0x8] sm:$0x1]  ;;  %v1222_v21 = vshrl.u32 %v4933_v22, 16 }
  0x50   : > { %v5218_v0 = vcombine.low %v1365_v51, %v1375_v55  ;;  %v1152_v55 = vrot.slane %v1150_v14, 4  ;;  %v1236_v14 = vshll.u32 %v4960_v29, 16 }
  0x52   : > { %6474 = vst [vmem:[#allocation9_spill] sm:$0xff] %v5218_v0  ;;  %v1224_v0 = vrot.slane %v1222_v21, 4  ;;  %v3840_v21 = vrot.slane %v5105_v16, 9 }
  0x55   : > { %4366 = vmatmul.mubr.msk.bf16.gmra.mxu1 %vm496_vm2, %v5068_v59  ;;  %4406 = vmatmul.mubr.msk.bf16.gmra.mxu0 %vm496_vm2, %v4895_v12  ;;  %v1194_v59 = vshll.u32 %v4909_v15, 16  ;;  %v1146_v15 = vshll.u32 %v5108_v17, 16 }
  0x56   : > { %4369 = vmatprep.mubr.msk.bf16.mxu1 %vm496_vm2, %v5112_v30  ;;  %4409 = vmatprep.mubr.msk.bf16.mxu0 %vm496_vm2, %v4937_v23  ;;  %v1140_v30 = vshll.u32 %v5105_v16, 16  ;;  %v1238_v16 = vrot.slane %v1236_v14, 5  ;;  %v5327_v14 = vld [vmem:[%s4866_s28 + $0x44] sm:$0x1] }
  0x57   : > { %v5236_v11 = vrot.slane %v1194_v59, 5 }
  0x58   : > { %v1142_v51 = vrot.slane %v1140_v30, 5 }
  0x59   : > { %v1201_v63 = vor.u32 %v1200_v26, %v5236_v11  ;;  %v1211_v26 = vrot.slane %v1209_v53, 4  ;;  %v1260_v53 = vshll.u32 %v4994_v38, 16 }
  0x5a   : > { %v1143_v59 = vor.u32 %v1142_v51, %v1139_v7  ;;  %v5270_v7 = vld [vmem:[%s5076_s7 + $0x10] sm:$0xf]  ;;  %v1204_v51 = vshll.u32 %v5248_v27, 16 }
  0x5b   : > { %v5274_v62 = vrot.slane %v1201_v63, 4 }
  0x5c   : > { %v1144_v44 = vrot.slane %v1143_v59, 4  ;;  %v1206_v49 = vrot.slane %v1204_v51, 5  ;;  %v1262_v51 = vrot.slane %v1260_v53, 5  ;;  %v1308_v53 = vshll.u32 %v5050_v54, 16 }
  0x5d   : > { %4370 = vmatmul.mubr.msk.bf16.gmra.mxu1 %vm496_vm2, %v4895_v12  ;;  %4410 = vmatmul.mubr.msk.bf16.gmra.mxu0 %vm496_vm2, %v4967_v31  ;;  %v1191_v12 = vor.u32 %v1190_v4, %v1187_v45  ;;  %v1218_v45 = vshll.u32 %v4933_v22, 16  ;;  %v1233_v4 = vshrl.u32 %v4960_v29, 16  ;;  %v1246_v29 = vshrl.u32 %v4970_v32, 16 }
  0x5e   : > { %4373 = vmatprep.mubr.msk.bf16.mxu1 %vm496_vm2, %v4937_v23  ;;  %4413 = vmatprep.mubr.msk.bf16.mxu0 %vm496_vm2, %v4991_v37  ;;  %v5243_v23 = vrot.slane %v1146_v15, 5  ;;  %v1156_v15 = vshll.u32 %v5241_v40, 16 }
  0x5f   : > { %v5251_v30 = vrot.slane %v1191_v12, 4  ;;  %v1214_v12 = vrot.slane %v1212_v20, 5  ;;  %v5283_v58 = vrot.slane %v1218_v45, 5  ;;  %v1284_v20 = vshll.u32 %v5025_v47, 16 }
  0x60   : > { %v1153_v22 = vor.u32 %v1152_v55, %v5243_v23  ;;  %v1158_v27 = vrot.slane %v1156_v15, 5  ;;  %v1242_v45 = vshll.u32 %v4970_v32, 16  ;;  %v2375_v55 = vrot.slane %v5108_v17, 5 }
  0x61   : > { %v1215_v59 = vor.u32 %v1214_v12, %v1211_v26  ;;  %v1225_v15 = vor.u32 %v1224_v0, %v5283_v58  ;;  %v1266_v26 = vshll.u32 %v4997_v39, 16  ;;  %v5305_v32 = vcombine.low %v4903_v13, %v5144_v46 }
  0x62   : > { %v1154_v50 = vrot.slane %v1153_v22, 4  ;;  %v2378_v22 = vrot.slane %v5241_v40, 5  ;;  %v5313_v17 = vsel %vm4884_vm3, %v3840_v21, %v2375_v55  ;;  %v2377_v39 = vrot.slane %v2375_v55, 4 }
  0x63   : > { %v1216_v40 = vrot.slane %v1215_v59, 4  ;;  %v1230_v13 = vrot.slane %v1228_v42, 5  ;;  %v1248_v46 = vrot.slane %v1246_v29, 4  ;;  %v5329_v12 = vrot.slane %v1266_v26, 5 }
  0x64   : > { %v1159_v0 = vsel %vm5130_vm6, %v1154_v50, %v1158_v27  ;;  %v1272_v55 = vrot.slane %v1270_v60, 4  ;;  %v1294_v50 = vshrl.u32 %v5034_v48, 16  ;;  %v1305_v27 = vshrl.u32 %v5050_v54, 16 }
  0x65   : > { %4374 = vmatmul.mubr.msk.bf16.gmra.mxu1 %vm496_vm2, %v4967_v31  ;;  %4414 = vmatmul.mubr.msk.bf16.gmra.mxu0 %vm496_vm2, %v5011_v43  ;;  %v5267_v31 = vld [vmem:[%s5076_s7 + $0xc] sm:$0xf]  ;;  %v1318_v59 = vshrl.u32 %v5061_v57, 16  ;;  %v1207_v21 = vsel %vm5130_vm6, %v5274_v62, %v1206_v49  ;;  %v1221_v54 = vsel %vm5130_vm6, %v1216_v40, %v5283_v58  ;;  %v1290_v49 = vshll.u32 %v5034_v48, 16 }
  0x66   : > { %4377 = vmatprep.mubr.msk.bf16.mxu1 %vm496_vm2, %v4991_v37  ;;  %4417 = vmatprep.mubr.msk.bf16.mxu0 %vm496_vm2, %v5058_v56  ;;  %v1257_v37 = vshrl.u32 %v4994_v38, 16  ;;  %v3717_v63 = vcombine.low %v5267_v31, %v5270_v7  ;;  %v1149_v38 = vsel %vm5130_vm6, %v1144_v44, %v5243_v23  ;;  %v5318_v23 = vld [vmem:[%s4866_s28 + $0x38] sm:$0x1]  ;;  %v1329_v62 = vshrl.u32 %v5085_v2, 16 }
  0x67   : > { %v3746_v29 = vcombine.low %v1149_v38, %v1159_v0  ;;  %v1252_v60 = vshll.u32 %v5318_v23, 16  ;;  %v1276_v38 = vshll.u32 %v5327_v14, 16 }
  0x68   : > { %v1259_v44 = vrot.slane %v1257_v37, 4 }
  0x6a   : > { %v1263_v26 = vor.u32 %v1262_v51, %v1259_v44  ;;  %v5371_v44 = vld [vmem:[%s4866_s28 + $0x50] sm:$0x1]  ;;  %v1286_v51 = vrot.slane %v1284_v20, 5 }
  0x6c   : > { %v1264_v40 = vrot.slane %v1263_v26, 4  ;;  %v6477_v26 = vrot.slane %v4889_v9, 5  ;;  %v2441_v9 = vrot.slane %v5203_v52, 5 }
  0x6d   : > { %4378 = vmatmul.mubr.msk.bf16.gmra.mxu1 %vm496_vm2, %v5011_v43  ;;  %4418 = vmatmul.mubr.msk.bf16.gmra.mxu0 %vm496_vm2, %v5080_v61  ;;  %v1235_v43 = vrot.slane %v1233_v4, 4  ;;  %v1226_v4 = vrot.slane %v1225_v15, 4 }
  0x6e   : > { %4381 = vmatprep.mubr.msk.bf16.mxu1 %vm496_vm2, %v5058_v56  ;;  %4421 = vmatprep.mubr.msk.bf16.mxu0 %vm496_vm2, %v5116_v35  ;;  %v5320_v56 = vrot.slane %v1242_v45, 5  ;;  %v5324_v35 = vsel %vm4884_vm3, %v2377_v39, %v2378_v22  ;;  %v1197_v45 = vsel %vm5130_vm6, %v5251_v30, %v5236_v11  ;;  %v1273_v30 = vor.u32 %v1272_v55, %v5329_v12 }
  0x6f   : > { %v1239_v37 = vor.u32 %v1238_v16, %v1235_v43  ;;  %v1231_v11 = vsel %vm5130_vm6, %v1226_v4, %v1230_v13  ;;  %v1332_v22 = vshll.u32 %v5085_v2, 16  ;;  %v1254_v43 = vrot.slane %v1252_v60, 5 }
  0x70   : > { %v1249_v15 = vor.u32 %v1248_v46, %v5320_v56  ;;  %v6476_v16 = vshrl.u32 %v5025_v47, 16  ;;  %v1314_v39 = vshll.u32 %v5061_v57, 16  ;;  %v5368_v0 = vcombine.low %v1221_v54, %v1231_v11 }
  0x71   : > { %v1240_v58 = vrot.slane %v1239_v37, 4  ;;  %v1278_v13 = vrot.slane %v1276_v38, 5  ;;  %v1274_v46 = vrot.slane %v1273_v30, 4  ;;  %v5375_v4 = vrot.slane %v1290_v49, 5  ;;  %v5381_v37 = vld [vmem:[%s4866_s28 + $0x5c] sm:$0x1] }
  0x72   : > { %v1283_v48 = vrot.slane %v6476_v16, 4  ;;  %v1250_v2 = vrot.slane %v1249_v15, 4  ;;  %v1296_v55 = vrot.slane %v1294_v50, 4  ;;  %v1307_v57 = vrot.slane %v1305_v27, 4 }
  0x73   : > { %v1320_v60 = vrot.slane %v1318_v59, 4  ;;  %v1338_v15 = vshll.u32 %v5092_v3, 16  ;;  %v6478_v47 = vrot.slane %v4875_v5, 9  ;;  %v6479_v50 = vmov %v6477_v26  ;;  %v4741_v5 = vld [vmem:[%s6444_s2 + $0x50] sm:$0xff]  }
  0x74   : > { %v2440_v38 = vrot.slane %v6479_v50, 4  ;;  %v1269_v27 = vsel %vm5130_vm6, %v1264_v40, %v5329_v12  ;;  %v1279_v12 = vsel %vm5130_vm6, %v1274_v46, %v1278_v13  ;;  %v1287_v59 = vor.u32 %v1286_v51, %v1283_v48  ;;  %v4744_v50 = vld [vmem:[%s6444_s2 + $0xe0] sm:$0xff]  }
  0x75   : > { %4382 = vmatmul.mubr.msk.bf16.gmra.mxu1 %vm496_vm2, %v5080_v61  ;;  %4422 = vmatmul.mubr.msk.bf16.gmra.mxu0 %vm496_vm2, %v3717_v63  ;;  %v1342_v61 = vshrl.u32 %v5092_v3, 16  ;;  %v5363_v63 = vcombine.low %v1197_v45, %v1207_v21  ;;  %v1310_v45 = vrot.slane %v1308_v53, 5  ;;  %v5383_v21 = vrot.slane %v1314_v39, 5  ;;  %v4740_v3 = vld [vmem:[%s6444_s2 + $0xf0] sm:$0xff]  }
  0x76   : > { %4433 = vmatprep.mubr.msk.bf16.mxu1 %vm496_vm2, %v3746_v29  ;;  %4473 = vmatprep.mubr.msk.bf16.mxu0 %vm496_vm2, %v5162_v10  ;;  %v1245_v29 = vsel %vm5130_vm6, %v1240_v58, %v5320_v56  ;;  %v2439_v20 = vsel %vm4884_vm3, %v6478_v47, %v6477_v26  ;;  %v1255_v56 = vsel %vm5130_vm6, %v1250_v2, %v1254_v43  ;;  %v1300_v53 = vshll.u32 %v5371_v44, 16  ;;  %v5425_v43 = vld [vmem:[%s4866_s28 + $0x68] sm:$0x1] }
  0x77   : > { %v1297_v54 = vor.u32 %v1296_v55, %v5375_v4  ;;  %v1324_v11 = vshll.u32 %v5381_v37, 16  ;;  %v1311_v52 = vor.u32 %v1310_v45, %v1307_v57  ;;  %v1331_v30 = vrot.slane %v1329_v62, 4  ;;  %v4743_v62 = vld [vmem:[%s6444_s2 + $0x48] sm:$0xff]  }
  0x78   : > { %v1334_v49 = vrot.slane %v1332_v22, 5  ;;  %v1321_v58 = vor.u32 %v1320_v60, %v5383_v21  ;;  %v5427_v16 = vrot.slane %v1338_v15, 5  ;;  %v1377_v48 = vshrl.u32 %v4920_v18, 16 }
  0x79   : > { %v5438_v39 = vcombine.low %v1245_v29, %v1255_v56  ;;  %v5440_v2 = vcombine.low %v1269_v27, %v1279_v12  ;;  %v1288_v40 = vrot.slane %v1287_v59, 4  ;;  %v1298_v13 = vrot.slane %v1297_v54, 4  ;;  %v5478_v12 = vld [vmem:[%s6444_s2 + $0xb8] sm:$0xff]   ;;  %v5486_v59 = vld [vmem:[%s4866_s28 + $0x80] sm:$0x1] }
  0x7a   : > { %v1312_v46 = vrot.slane %v1311_v52, 4  ;;  %v1335_v51 = vor.u32 %v1334_v49, %v1331_v30  ;;  %v1348_v55 = vshll.u32 %v5425_v43, 16  ;;  %v1380_v57 = vshll.u32 %v4920_v18, 16  ;;  %v4745_v18 = vld [vmem:[%s6444_s2 + $0x40] sm:$0xff]  }
  0x7b   : > { %v1322_v45 = vrot.slane %v1321_v58, 4  ;;  %v1326_v60 = vrot.slane %v1324_v11, 5  ;;  %v1390_v29 = vshrl.u32 %v4923_v19, 16  ;;  %v1401_v26 = vshrl.u32 %v4940_v24, 16 }
  0x7c   : > { %v1404_v47 = vshll.u32 %v4940_v24, 16  ;;  %v1410_v24 = vshll.u32 %v4943_v25, 16  ;;  %v1317_v27 = vsel %vm5130_vm6, %v1312_v46, %v5383_v21  ;;  %v5483_v21 = vld [vmem:[%s6444_s2 + $0x118] sm:$0xff]  }
  0x7d   : > { %4434 = vmatmul.mubr.msk.bf16.vlgmr.msra.gmra.mxu1 %vm496_vm2, %v5162_v10  ;;  %4474 = vmatmul.mubr.msk.bf16.vlgmr.msra.gmra.mxu0 %vm496_vm2, %v5363_v63  ;;  %v2442_v10 = vsel %vm4884_vm3, %v2440_v38, %v2441_v9  ;;  %v1414_v38 = vshrl.u32 %v4943_v25, 16  ;;  %v1379_v25 = vrot.slane %v1377_v48, 4  ;;  %v1382_v9 = vrot.slane %v1380_v57, 5 }
  0x7e   : > { %4506 = vmatpush3.bf16.msra.mxu1 %v5185_v28  ;;  %4546 = vmatpush3.bf16.msra.mxu0 %v5190_v36  ;;  %v1344_v28 = vrot.slane %v1342_v61, 4  ;;  %v4742_v36 = vld [vmem:[%s6444_s2 + $0xe8] sm:$0xff]   ;;  %v5435_v22 = vcombine.low %v2439_v20, %v2442_v10  ;;  %v1302_v61 = vrot.slane %v1300_v53, 5  ;;  %v1386_v20 = vshll.u32 %v4923_v19, 16 }
  0x7f   : > { %4437 = vmatprep.mubr.msk.bf16.mxu1 %vm496_vm2, %v5363_v63  ;;  %4477 = vmatprep.mubr.msk.bf16.mxu0 %vm496_vm2, %v5368_v0  ;;  %v1293_v19 = vsel %vm5130_vm6, %v1288_v40, %v5375_v4  ;;  %v1336_v53 = vrot.slane %v1335_v51, 4  ;;  %v1327_v4 = vsel %vm5130_vm6, %v1322_v45, %v1326_v60  ;;  %v1392_v11 = vrot.slane %v1390_v29, 4  ;;  %v6480_v29 = vld [vmem:[#allocation2_spill] sm:$0xff] }
  0x80   : > { %4507 = vmatprep.subr.bf16.mxu1 %v4740_v3  ;;  %4547 = vmatprep.subr.bf16.mxu0 %v4741_v5  ;;  %v1345_v15 = vor.u32 %v1344_v28, %v5427_v16  ;;  %v1303_v56 = vsel %vm5130_vm6, %v1298_v13, %v1302_v61  ;;  %v5488_v54 = vrot.slane %v1386_v20, 5  ;;  %v1403_v52 = vrot.slane %v1401_v26, 4 }
  0x81   : > { %v1406_v30 = vrot.slane %v1404_v47, 5  ;;  %v5490_v49 = vcombine.low %v1293_v19, %v1303_v56  ;;  %v5492_v10 = vrot.slane %v1410_v24, 5  ;;  %v1416_v58 = vrot.slane %v1414_v38, 4 }
  0x82   : > { %4508 = vmatpush3.bf16.msra.mxu1 %v4740_v3  ;;  %4548 = vmatpush3.bf16.msra.mxu0 %v4741_v5  ;;  %v1350_v3 = vrot.slane %v1348_v55, 5  ;;  %v1346_v5 = vrot.slane %v1345_v15, 4  ;;  %v5494_v28 = vcombine.low %v1317_v27, %v1327_v4  ;;  %v1341_v48 = vsel %vm5130_vm6, %v1336_v53, %v5427_v16  ;;  %v5529_v27 = vld [vmem:[%s4866_s28 + $0x98] sm:$0x1]  ;;  %v5534_v4 = vld [vmem:[%s4866_s28 + $0xa4] sm:$0x1] }
  0x83   : > { %4509 = vmatprep.subr.bf16.mxu1 %v4742_v36  ;;  %4549 = vmatprep.subr.bf16.mxu0 %v4743_v62  ;;  %v1383_v40 = vor.u32 %v1382_v9, %v1379_v25  ;;  %v1396_v61 = vshll.u32 %v5486_v59, 16  ;;  %v1428_v13 = vshll.u32 %v4973_v33, 16  ;;  %v1393_v51 = vor.u32 %v1392_v11, %v5488_v54 }
  0x84   : > { %v1351_v46 = vsel %vm5130_vm6, %v1346_v5, %v1350_v3  ;;  %v1407_v55 = vor.u32 %v1406_v30, %v1403_v52  ;;  %v1438_v57 = vshrl.u32 %v4976_v34, 16  ;;  %v1434_v45 = vshll.u32 %v4976_v34, 16  ;;  %v6481_v52 = vld [vmem:[#allocation3_spill] sm:$0xff] }
  0x85   : > { %4438 = vmatmul.mubr.msk.bf16.gmra.mxu1 %vm496_vm2, %v5368_v0  ;;  %4478 = vmatmul.mubr.msk.bf16.gmra.mxu0 %vm496_vm2, %v5438_v39  ;;  %v1449_v60 = vshrl.u32 %v5004_v41, 16  ;;  %v1452_v15 = vshll.u32 %v5004_v41, 16  ;;  %v1462_v26 = vshrl.u32 %v6480_v29, 16  ;;  %v1458_v47 = vshll.u32 %v6480_v29, 16 }
  0x86   : > { %4441 = vmatprep.mubr.msk.bf16.mxu1 %vm496_vm2, %v5438_v39  ;;  %4481 = vmatprep.mubr.msk.bf16.mxu0 %vm496_vm2, %v5440_v2  ;;  %v5526_v20 = vcombine.low %v1341_v48, %v1351_v46  ;;  %v1398_v34 = vrot.slane %v1396_v61, 5  ;;  %v1408_v38 = vrot.slane %v1407_v55, 4  ;;  %v1430_v24 = vrot.slane %v1428_v13, 5  ;;  %v6482_v55 = vld [vmem:[#allocation4_spill] sm:$0xff] }
  0x87   : > { %4510 = vmatpush3.bf16.msra.mxu1 %v4742_v36  ;;  %4550 = vmatpush3.bf16.msra.mxu0 %v4743_v62  ;;  %v5497_v36 = vld [vmem:[%s4866_s28 + $0x8c] sm:$0x1]  ;;  %v1425_v62 = vshrl.u32 %v4973_v33, 16  ;;  %v1417_v33 = vor.u32 %v1416_v58, %v5492_v10  ;;  %v5531_v53 = vrot.slane %v1434_v45, 5  ;;  %v1440_v3 = vrot.slane %v1438_v57, 4 }
  0x88   : > { %4511 = vmatprep.subr.bf16.mxu1 %v4744_v50  ;;  %4551 = vmatprep.subr.bf16.mxu0 %v4745_v18  ;;  %v1420_v16 = vshll.u32 %v5497_v36, 16  ;;  %v1451_v5 = vrot.slane %v1449_v60, 4  ;;  %v1454_v25 = vrot.slane %v1452_v15, 5  ;;  %v1460_v9 = vrot.slane %v1458_v47, 5  ;;  %v6484_v60 = vld [vmem:[#allocation5_spill] sm:$0xff] }
  0x89   : > { %v1427_v19 = vrot.slane %v1425_v62, 4  ;;  %v1418_v41 = vrot.slane %v1417_v33, 4  ;;  %v1464_v11 = vrot.slane %v1462_v26, 4  ;;  %v1473_v30 = vshrl.u32 %v6481_v52, 16  ;;  %v6483_v33 = vld [vmem:[#allocation9_spill] sm:$0xff]  ;;  %v6485_v26 = vld [vmem:[#allocation6_spill] sm:$0xff] }
  0x8a   : > { %v1422_v56 = vrot.slane %v1420_v16, 5  ;;  %v1476_v58 = vshll.u32 %v6481_v52, 16  ;;  %v1444_v61 = vshll.u32 %v5529_v27, 16  ;;  %v1413_v13 = vsel %vm5130_vm6, %v1408_v38, %v5492_v10 }
  0x8b   : > { %4512 = vmatpush3.bf16.msra.mxu1 %v4744_v50  ;;  %4552 = vmatpush3.bf16.msra.mxu0 %v4745_v18  ;;  %v1384_v50 = vrot.slane %v1383_v40, 4  ;;  %v1394_v18 = vrot.slane %v1393_v51, 4  ;;  %v1431_v40 = vor.u32 %v1430_v24, %v1427_v19  ;;  %v1468_v51 = vshll.u32 %v5534_v4, 16 }
  0x8c   : > { %4585 = vmatprep.subr.bf16.mxu1 %v5478_v12  ;;  %4625 = vmatprep.subr.bf16.mxu0 %v5483_v21  ;;  %v1423_v46 = vsel %vm5130_vm6, %v1418_v41, %v1422_v56  ;;  %v1486_v57 = vshrl.u32 %v6482_v55, 16  ;;  %v1455_v16 = vor.u32 %v1454_v25, %v1451_v5  ;;  %v1465_v45 = vor.u32 %v1464_v11, %v1460_v9  ;;  %v5570_v11 = vld [vmem:[%s4866_s28 + $0xb0] sm:$0x1] }
  0x8d   : > { %4442 = vmatmul.mubr.msk.bf16.gmra.mxu1 %vm496_vm2, %v5440_v2  ;;  %4482 = vmatmul.mubr.msk.bf16.gmra.mxu0 %vm496_vm2, %v5490_v49  ;;  %v1389_v62 = vsel %vm5130_vm6, %v1384_v50, %v5488_v54  ;;  %v1399_v48 = vsel %vm5130_vm6, %v1394_v18, %v1398_v34  ;;  %v1441_v54 = vor.u32 %v1440_v3, %v5531_v53  ;;  %v1482_v10 = vshll.u32 %v6482_v55, 16 }
  0x8e   : > { %4445 = vmatprep.mubr.msk.bf16.mxu1 %vm496_vm2, %v5490_v49  ;;  %4485 = vmatprep.mubr.msk.bf16.mxu0 %vm496_vm2, %v5494_v28  ;;  %v1497_v15 = vshrl.u32 %v6484_v60, 16  ;;  %v1500_v29 = vshll.u32 %v6484_v60, 16  ;;  %v1510_v47 = vshrl.u32 %v6485_v26, 16  ;;  %v1506_v50 = vshll.u32 %v6485_v26, 16 }
  0x8f   : > { %v5565_v34 = vcombine.low %v1389_v62, %v1399_v48  ;;  %v5567_v18 = vcombine.low %v1413_v13, %v1423_v46  ;;  %v1432_v38 = vrot.slane %v1431_v40, 4  ;;  %v1446_v19 = vrot.slane %v1444_v61, 5  ;;  %v6486_v48 = vld [vmem:[#allocation7_spill] sm:$0xff]  ;;  %v6487_v61 = vld [vmem:[#allocation8_spill] sm:$0xff] }
  0x90   : > { %v1442_v24 = vrot.slane %v1441_v54, 4  ;;  %v1470_v41 = vrot.slane %v1468_v51, 5  ;;  %v1475_v56 = vrot.slane %v1473_v30, 4  ;;  %v1478_v3 = vrot.slane %v1476_v58, 5  ;;  %v5576_v54 = vld [vmem:[%s4866_s28 + $0xbc] sm:$0x1] }
  0x91   : > { %v1456_v5 = vrot.slane %v1455_v16, 4  ;;  %v1466_v25 = vrot.slane %v1465_v45, 4  ;;  %v1484_v52 = vrot.slane %v1482_v10, 5  ;;  %v1488_v55 = vrot.slane %v1486_v57, 4 }
  0x92   : > { %v1499_v60 = vrot.slane %v1497_v15, 4  ;;  %v1502_v42 = vrot.slane %v1500_v29, 5  ;;  %v1508_v26 = vrot.slane %v1506_v50, 5  ;;  %v1512_v62 = vrot.slane %v1510_v47, 4 }
  0x93   : > { %v1843_v13 = vshrl.u32 %v6486_v48, 16  ;;  %v1846_v40 = vshll.u32 %v6486_v48, 16  ;;  %v1856_v46 = vshrl.u32 %v6487_v61, 16  ;;  %v1437_v30 = vsel %vm5130_vm6, %v1432_v38, %v5531_v53 }
  0x94   : > { %v1447_v58 = vsel %vm5130_vm6, %v1442_v24, %v1446_v19  ;;  %v1479_v51 = vor.u32 %v1478_v3, %v1475_v56  ;;  %v1492_v57 = vshll.u32 %v5570_v11, 16  ;;  %v1461_v16 = vsel %vm5130_vm6, %v1456_v5, %v1460_v9 }
  0x95   : > { %4446 = vmatmul.mubr.msk.bf16.gmra.mxu1 %vm496_vm2, %v5494_v28  ;;  %4486 = vmatmul.mubr.msk.bf16.gmra.mxu0 %vm496_vm2, %v5526_v20  ;;  %v1471_v45 = vsel %vm5130_vm6, %v1466_v25, %v1470_v41  ;;  %v1489_v10 = vor.u32 %v1488_v55, %v1484_v52  ;;  %v1852_v53 = vshll.u32 %v6487_v61, 16  ;;  %v1503_v15 = vor.u32 %v1502_v42, %v1499_v60  ;;  %v5603_v61 = vld [vmem:[%s5076_s7 + $0x8] sm:$0x1] }
  0x96   : > { %4449 = vmatprep.mubr.msk.bf16.mxu1 %vm496_vm2, %v5526_v20  ;;  %4489 = vmatprep.mubr.msk.bf16.mxu0 %vm496_vm2, %v6483_v33  ;;  %v1513_v29 = vor.u32 %v1512_v62, %v1508_v26  ;;  %v1516_v47 = vshll.u32 %v5576_v54, 16  ;;  %v5598_v50 = vcombine.low %v1437_v30, %v1447_v58  ;;  %v5600_v38 = vcombine.low %v1461_v16, %v1471_v45 }
  0x97   : > { %v1480_v19 = vrot.slane %v1479_v51, 4  ;;  %v1494_v24 = vrot.slane %v1492_v57, 5  ;;  %v1845_v56 = vrot.slane %v1843_v13, 4  ;;  %v1490_v3 = vrot.slane %v1489_v10, 4 }
  0x98   : > { %v1848_v9 = vrot.slane %v1846_v40, 5  ;;  %v1854_v5 = vrot.slane %v1852_v53, 5  ;;  %v1858_v48 = vrot.slane %v1856_v46, 4  ;;  %v1504_v41 = vrot.slane %v1503_v15, 4 }
  0x99   : > { %v1514_v25 = vrot.slane %v1513_v29, 4  ;;  %v1518_v55 = vrot.slane %v1516_v47, 5  ;;  %v1485_v42 = vsel %vm5130_vm6, %v1480_v19, %v1484_v52  ;;  %v1495_v60 = vsel %vm5130_vm6, %v1490_v3, %v1494_v24  ;;  %v4754_v47 = vld [vmem:[%s4866_s28 + $0x1c] sm:$0xf] }
  0x9a   : > { %v1849_v62 = vor.u32 %v1848_v9, %v1845_v56  ;;  %v1859_v13 = vor.u32 %v1858_v48, %v1854_v5  ;;  %v1862_v40 = vshll.u32 %v5603_v61, 16  ;;  %v1509_v46 = vsel %vm5130_vm6, %v1504_v41, %v1508_v26  ;;  %v5632_v26 = vld [vmem:[%s5076_s7 + $0x14] sm:$0x1]  ;;  %v4755_v48 = vld [vmem:[%s4866_s28 + $0x18] sm:$0xf] }
  0x9b   : > { %v1519_v52 = vsel %vm5130_vm6, %v1514_v25, %v1518_v55  ;;  %v5622_v30 = vcombine.low %v1485_v42, %v1495_v60  ;;  %v3050_v45 = vrot.slane %v5270_v7, 5  ;;  %v3930_v10 = vrot.slane %v5267_v31, 9  ;;  %v6488_v55 = vld [vmem:[#allocation10_spill] sm:$0xff] }
  0x9c   : > { %v5624_v58 = vcombine.low %v1509_v46, %v1519_v52  ;;  %v1850_v51 = vrot.slane %v1849_v62, 4  ;;  %v1860_v57 = vrot.slane %v1859_v13, 4  ;;  %v1864_v16 = vrot.slane %v1862_v40, 5  ;;  %v4756_v62 = vld [vmem:[%s4866_s28 + $0x28] sm:$0xf] }
  0x9d   : > { %4450 = vmatmul.mubr.msk.bf16.gmra.mxu1 %vm496_vm2, %v6483_v33  ;;  %4490 = vmatmul.mubr.msk.bf16.gmra.mxu0 %vm496_vm2, %v5565_v34  ;;  %v3053_v29 = vrot.slane %v5632_v26, 5  ;;  %v2389_v19 = vrot.slane %v4754_v47, 5  ;;  %v3052_v24 = vrot.slane %v3050_v45, 4  ;;  %v5649_v3 = vsel %vm4884_vm3, %v3930_v10, %v3050_v45  ;;  %v4757_v40 = vld [vmem:[%s4866_s28 + $0x34] sm:$0xf] }
  0x9e   : > { %4453 = vmatprep.mubr.msk.bf16.mxu1 %vm496_vm2, %v5565_v34  ;;  %4493 = vmatprep.mubr.msk.bf16.mxu0 %vm496_vm2, %v5567_v18  ;;  %v1855_v53 = vsel %vm5130_vm6, %v1850_v51, %v1854_v5  ;;  %v1865_v15 = vsel %vm5130_vm6, %v1860_v57, %v1864_v16  ;;  %v3842_v41 = vrot.slane %v4755_v48, 9  ;;  %v2392_v42 = vrot.slane %v6488_v55, 5  ;;  %v4758_v57 = vld [vmem:[%s4866_s28 + $0x24] sm:$0xf]  ;;  %v4749_v47 = vld [vmem:[%s6444_s2 + $0x110] sm:$0xff]  }
  0x9f   : > { %v5645_v56 = vcombine.low %v1855_v53, %v1865_v15  ;;  %v5653_v9 = vsel %vm4884_vm3, %v3052_v24, %v3053_v29  ;;  %v2391_v25 = vrot.slane %v2389_v19, 4  ;;  %v6489_v60 = vcombine.low %v5313_v17, %v5324_v35  ;;  %v4759_v17 = vld [vmem:[%s4866_s28 + $0x30] sm:$0xf] }
  0xa0   : > { %v3939_v5 = vcombine.low %v5649_v3, %v5653_v9  ;;  %v2396_v13 = vrot.slane %v4756_v62, 5  ;;  %v2403_v46 = vrot.slane %v4757_v40, 5  ;;  %v2390_v52 = vsel %vm4884_vm3, %v3842_v41, %v2389_v19  ;;  %v4748_v29 = vld [vmem:[%s6444_s2 + $0xb0] sm:$0xff]   ;;  %v4760_v19 = vld [vmem:[%s4866_s28 + $0x40] sm:$0xf]  ;;  %v4750_v41 = vld [vmem:[%s6444_s2 + $0xa8] sm:$0xff]  }
  0xa1   : > { %v2393_v51 = vsel %vm4884_vm3, %v2391_v25, %v2392_v42  ;;  %v3843_v16 = vrot.slane %v4758_v57, 9  ;;  %v3844_v35 = vrot.slane %v4759_v17, 9  ;;  %v2406_v15 = vrot.slane %v5318_v23, 5  ;;  %v4762_v42 = vld [vmem:[%s4866_s28 + $0x3c] sm:$0xf]  ;;  %v4752_v57 = vld [vmem:[%s6444_s2 + $0xa0] sm:$0xff]  }
  0xa2   : > { %v2398_v45 = vrot.slane %v2396_v13, 4  ;;  %v5677_v10 = vcombine.low %v2390_v52, %v2393_v51  ;;  %v2405_v53 = vrot.slane %v2403_v46, 4  ;;  %v2410_v24 = vrot.slane %v4760_v19, 5  ;;  %v4763_v40 = vld [vmem:[%s4866_s28 + $0x48] sm:$0xf] }
  0xa3   : > { %v2420_v51 = vrot.slane %v5371_v44, 5  ;;  %v4767_v19 = vld [vmem:[%s4866_s28 + $0x60] sm:$0xf] }
  0xa4   : > { %v2412_v62 = vrot.slane %v2410_v24, 4 }
  0xa5   : > { %4454 = vmatmul.mubr.msk.bf16.gmra.mxu1 %vm496_vm2, %v5567_v18  ;;  %4494 = vmatmul.mubr.msk.bf16.gmra.mxu0 %vm496_vm2, %v5598_v50 }
  0xa6   : > { %4457 = vmatprep.mubr.msk.bf16.mxu1 %vm496_vm2, %v5598_v50  ;;  %4497 = vmatprep.mubr.msk.bf16.mxu0 %vm496_vm2, %v5600_v38 }
  0xad   : > { %4458 = vmatmul.mubr.msk.bf16.gmra.mxu1 %vm496_vm2, %v5600_v38  ;;  %4498 = vmatmul.mubr.msk.bf16.gmra.mxu0 %vm496_vm2, %v5622_v30 }
  0xae   : > { %4461 = vmatprep.mubr.msk.bf16.mxu1 %vm496_vm2, %v5622_v30  ;;  %4501 = vmatprep.mubr.msk.bf16.mxu0 %vm496_vm2, %v5624_v58 }
  0xb5   : > { %4462 = vmatmul.mubr.msk.bf16.gmra.mxu1 %vm496_vm2, %v5624_v58  ;;  %4502 = vmatmul.mubr.msk.bf16.gmra.mxu0 %vm496_vm2, %v5645_v56 }
  0xb6   : > { %4513 = vmatprep.mubr.msk.bf16.mxu1 %vm496_vm2, %v5363_v63  ;;  %4553 = vmatprep.mubr.msk.bf16.mxu0 %vm496_vm2, %v6489_v60  ;;  %v2399_v63 = vrot.slane %v5279_v6, 5  ;;  %v2397_v6 = vsel %vm4884_vm3, %v3843_v16, %v2396_v13  ;;  %v3845_v60 = vrot.slane %v4762_v42, 9  ;;  %v2413_v13 = vrot.slane %v5327_v14, 5  ;;  %v4753_v16 = vld [vmem:[%s6444_s2 + $0x100] sm:$0xff]   ;;  %v4769_v42 = vld [vmem:[%s4866_s28 + $0x78] sm:$0xf] }
  0xb8   : > { %v2400_v23 = vsel %vm4884_vm3, %v2398_v45, %v2399_v63  ;;  %v2411_v14 = vsel %vm4884_vm3, %v3845_v60, %v2410_v24  ;;  %v2414_v44 = vsel %vm4884_vm3, %v2412_v62, %v2413_v13  ;;  %v4764_v45 = vld [vmem:[%s4866_s28 + $0x58] sm:$0xf]  ;;  %v3848_v24 = vrot.slane %v4767_v19, 9 }
  0xb9   : > { %v5713_v25 = vcombine.low %v2397_v6, %v2400_v23  ;;  %v2424_v63 = vrot.slane %v4764_v45, 5  ;;  %v2427_v23 = vrot.slane %v5381_v37, 5  ;;  %v3850_v60 = vrot.slane %v4769_v42, 9 }
  0xba   : > { %v2448_v13 = vrot.slane %v5486_v59, 5  ;;  %v2112_v19 = vshrl.u32 %v5270_v7, 16 }
  0xbb   : > { %v2426_v6 = vrot.slane %v2424_v63, 4 }
  0xbd   : > { %4514 = vmatmul.mubr.msk.bf16.vlgmr.msra.gmra.mxu1 %vm496_vm2, %v5368_v0  ;;  %4554 = vmatmul.mubr.msk.bf16.vlgmr.msra.gmra.mxu0 %vm496_vm2, %v5305_v32  ;;  %v2404_v0 = vsel %vm4884_vm3, %v3844_v35, %v2403_v46  ;;  %v3846_v46 = vrot.slane %v4763_v40, 9  ;;  %v4770_v40 = vld [vmem:[%s4866_s28 + $0x88] sm:$0xf] }
  0xbe   : > { %4586 = vmatpush3.bf16.msra.mxu1 %v5478_v12  ;;  %4626 = vmatpush3.bf16.msra.mxu0 %v5483_v21  ;;  %v2407_v12 = vsel %vm4884_vm3, %v2405_v53, %v2406_v15  ;;  %v4761_v21 = vld [vmem:[%s4866_s28 + $0x4c] sm:$0xf]  ;;  %v5745_v53 = vcombine.low %v2411_v14, %v2414_v44  ;;  %v2455_v44 = vrot.slane %v5497_v36, 5 }
  0xbf   : > { %4517 = vmatprep.mubr.msk.bf16.mxu1 %vm496_vm2, %v5438_v39  ;;  %4557 = vmatprep.mubr.msk.bf16.mxu0 %vm496_vm2, %v5677_v10  ;;  %v2417_v48 = vrot.slane %v4761_v21, 5  ;;  %v4751_v39 = vld [vmem:[%s6444_s2 + $0x108] sm:$0xff]   ;;  %v5715_v55 = vcombine.low %v2404_v0, %v2407_v12  ;;  %v2434_v12 = vrot.slane %v5425_v43, 5  ;;  %v2428_v43 = vsel %vm4884_vm3, %v2426_v6, %v2427_v23 }
  0xc0   : > { %4587 = vmatprep.subr.bf16.mxu1 %v4748_v29  ;;  %4627 = vmatprep.subr.bf16.mxu0 %v4749_v47 }
  0xc1   : > { %v2419_v52 = vrot.slane %v2417_v48, 4 }
  0xc2   : > { %4588 = vmatpush3.bf16.msra.mxu1 %v4748_v29  ;;  %4628 = vmatpush3.bf16.msra.mxu0 %v4749_v47  ;;  %v4766_v29 = vld [vmem:[%s4866_s28 + $0x54] sm:$0xf] }
  0xc3   : > { %4589 = vmatprep.subr.bf16.mxu1 %v4750_v41  ;;  %4629 = vmatprep.subr.bf16.mxu0 %v4751_v39  ;;  %v2421_v17 = vsel %vm4884_vm3, %v2419_v52, %v2420_v51  ;;  %v3847_v47 = vrot.slane %v4766_v29, 9  ;;  %v4771_v51 = vld [vmem:[%s4866_s28 + $0x94] sm:$0xf]  ;;  %v2099_v29 = vshrl.u32 %v5267_v31, 16 }
  0xc5   : > { %4518 = vmatmul.mubr.msk.bf16.gmra.mxu1 %vm496_vm2, %v5440_v2  ;;  %4558 = vmatmul.mubr.msk.bf16.gmra.mxu0 %vm496_vm2, %v5713_v25  ;;  %v2418_v2 = vsel %vm4884_vm3, %v3846_v46, %v2417_v48  ;;  %v2425_v37 = vsel %vm4884_vm3, %v3847_v47, %v2424_v63  ;;  %v4768_v48 = vld [vmem:[%s4866_s28 + $0x7c] sm:$0xf]  ;;  %v2452_v46 = vrot.slane %v4770_v40, 5  ;;  %v4773_v63 = vld [vmem:[%s4866_s28 + $0x90] sm:$0xf]  ;;  %v2102_v47 = vshll.u32 %v5267_v31, 16 }
  0xc6   : > { %4521 = vmatprep.mubr.msk.bf16.mxu1 %vm496_vm2, %v5490_v49  ;;  %4561 = vmatprep.mubr.msk.bf16.mxu0 %vm496_vm2, %v5715_v55  ;;  %v4765_v49 = vld [vmem:[%s4866_s28 + $0x64] sm:$0xf]  ;;  %v5747_v15 = vcombine.low %v2418_v2, %v2421_v17  ;;  %v2462_v17 = vrot.slane %v5529_v27, 5  ;;  %v4775_v31 = vld [vmem:[%s4866_s28 + $0xac] sm:$0xf]  ;;  %v2101_v40 = vrot.slane %v2099_v29, 4 }
  0xc7   : > { %v2431_v35 = vrot.slane %v4765_v49, 5  ;;  %4590 = vmatpush3.bf16.msra.mxu1 %v4750_v41  ;;  %4630 = vmatpush3.bf16.msra.mxu0 %v4751_v39  ;;  %v2445_v41 = vrot.slane %v4768_v48, 5  ;;  %v2454_v14 = vrot.slane %v2452_v46, 4  ;;  %v4774_v49 = vld [vmem:[%s4866_s28 + $0xa0] sm:$0xf] }
  0xc8   : > { %4591 = vmatprep.subr.bf16.mxu1 %v4752_v57  ;;  %4631 = vmatprep.subr.bf16.mxu0 %v4753_v16 }
  0xc9   : > { %v2433_v0 = vrot.slane %v2431_v35, 4  ;;  %v2432_v21 = vsel %vm4884_vm3, %v3848_v24, %v2431_v35  ;;  %v2447_v62 = vrot.slane %v2445_v41, 4  ;;  %v2446_v52 = vsel %vm4884_vm3, %v3850_v60, %v2445_v41  ;;  %v4777_v60 = vld [vmem:[%s4866_s28 + $0xa8] sm:$0xf] }
  0xca   : > { %v2466_v35 = vrot.slane %v4774_v49, 5  ;;  %v2456_v27 = vsel %vm4884_vm3, %v2454_v14, %v2455_v44  ;;  %v2108_v24 = vshll.u32 %v5270_v7, 16  ;;  %v2469_v41 = vrot.slane %v5534_v4, 5  ;;  %v4778_v49 = vld [vmem:[%s4866_s28 + $0xb8] sm:$0xf] }
  0xcb   : > { %4592 = vmatpush3.bf16.msra.mxu1 %v4752_v57  ;;  %4632 = vmatpush3.bf16.msra.mxu0 %v4753_v16  ;;  %v2449_v59 = vsel %vm4884_vm3, %v2447_v62, %v2448_v13  ;;  %v4772_v57 = vld [vmem:[%s4866_s28 + $0x84] sm:$0xf]  ;;  %v3854_v62 = vrot.slane %v4777_v60, 9  ;;  %v2476_v13 = vrot.slane %v5570_v11, 5 }
  0xcc   : > { %v3851_v16 = vrot.slane %v4772_v57, 9  ;;  %v5792_v45 = vcombine.low %v2446_v52, %v2449_v59  ;;  %v2468_v48 = vrot.slane %v2466_v35, 4 }
  0xcd   : > { %4522 = vmatmul.mubr.msk.bf16.gmra.mxu1 %vm496_vm2, %v5494_v28  ;;  %4562 = vmatmul.mubr.msk.bf16.gmra.mxu0 %vm496_vm2, %v5745_v53  ;;  %v2435_v28 = vsel %vm4884_vm3, %v2433_v0, %v2434_v12 }
  0xce   : > { %4525 = vmatprep.mubr.msk.bf16.mxu1 %vm496_vm2, %v5526_v20  ;;  %4565 = vmatprep.mubr.msk.bf16.mxu0 %vm496_vm2, %v5747_v15  ;;  %v5770_v20 = vcombine.low %v2425_v37, %v2428_v43  ;;  %v5772_v39 = vcombine.low %v2432_v21, %v2435_v28  ;;  %v2453_v36 = vsel %vm4884_vm3, %v3851_v16, %v2452_v46  ;;  %v2104_v46 = vrot.slane %v2102_v47, 5 }
  0xcf   : > { %v5826_v21 = vcombine.low %v2453_v36, %v2456_v27  ;;  %v2470_v11 = vsel %vm4884_vm3, %v2468_v48, %v2469_v41 }
  0xd5   : > { %4526 = vmatmul.mubr.msk.bf16.gmra.mxu1 %vm496_vm2, %v6483_v33  ;;  %4566 = vmatmul.mubr.msk.bf16.gmra.mxu0 %vm496_vm2, %v5770_v20  ;;  %v2459_v33 = vrot.slane %v4771_v51, 5  ;;  %v2110_v51 = vrot.slane %v2108_v24, 5 }
  0xd6   : > { %4529 = vmatprep.mubr.msk.bf16.mxu1 %vm496_vm2, %v5565_v34  ;;  %4569 = vmatprep.mubr.msk.bf16.mxu0 %vm496_vm2, %v5772_v39  ;;  %v3852_v34 = vrot.slane %v4773_v63, 9 }
  0xd7   : > { %v2461_v2 = vrot.slane %v2459_v33, 4 }
  0xd8   : > { %v2460_v37 = vsel %vm4884_vm3, %v3852_v34, %v2459_v33  ;;  %v2114_v33 = vrot.slane %v2112_v19, 4  ;;  %v2105_v34 = vor.u32 %v2104_v46, %v2101_v40 }
  0xd9   : > { %v2463_v43 = vsel %vm4884_vm3, %v2461_v2, %v2462_v17  ;;  %v2118_v17 = vshll.u32 %v5632_v26, 16 }
  0xda   : > { %v5836_v52 = vcombine.low %v2460_v37, %v2463_v43  ;;  %v2115_v2 = vor.u32 %v2114_v33, %v2110_v51 }
  0xdb   : > { %v2120_v43 = vrot.slane %v2118_v17, 5 }
  0xdc   : > { %v2116_v37 = vrot.slane %v2115_v2, 4 }
  0xdd   : > { %v5799_v6 = vpop.f32.mrf.mxu0  ;;  %v5801_v23 = vpop.f32.mrf.mxu1  ;;  %4530 = vmatmul.mubr.msk.bf16.gmra.mxu1 %vm496_vm2, %v5567_v18  ;;  %4570 = vmatmul.mubr.msk.bf16.gmra.mxu0 %vm496_vm2, %v5435_v22  ;;  %v2473_v18 = vrot.slane %v4775_v31, 5  ;;  %v2106_v31 = vrot.slane %v2105_v34, 4 }
  0xde   : > { %4533 = vmatprep.mubr.msk.bf16.mxu1 %vm496_vm2, %v5598_v50  ;;  %4573 = vmatprep.mubr.msk.bf16.mxu0 %vm496_vm2, %v5792_v45  ;;  %v4776_v50 = vld [vmem:[%s4866_s28 + $0x9c] sm:$0xf] }
  0xdf   : > { %v5818_v0 = vpop.f32.mrf.mxu0  ;;  %v5820_v12 = vpop.f32.mrf.mxu1  ;;  %v3853_v28 = vrot.slane %v4776_v50, 9  ;;  %v2475_v59 = vrot.slane %v2473_v18, 4  ;;  %v2474_v63 = vsel %vm4884_vm3, %v3854_v62, %v2473_v18  ;;  %v4779_v18 = vld [vmem:[%s4866_s28 + $0xb4] sm:$0xf]  ;;  %v2483_v50 = vrot.slane %v5576_v54, 5 }
  0xe0   : > { %v3855_v24 = vrot.slane %v4779_v18, 9  ;;  %v2111_v54 = vsel %vm5130_vm6, %v2106_v31, %v2110_v51 }
  0xe1   : > { %v5830_v42 = vpop.f32.mrf.mxu0  ;;  %v5832_v7 = vpop.f32.mrf.mxu1  ;;  %v2467_v4 = vsel %vm4884_vm3, %v3853_v28, %v2466_v35  ;;  %v2480_v35 = vrot.slane %v4778_v49, 5 }
  0xe3   : > { %v5838_v57 = vpop.f32.mrf.mxu0  ;;  %v5840_v16 = vpop.f32.mrf.mxu1  ;;  %v2482_v26 = vrot.slane %v2480_v35, 4  ;;  %v2481_v62 = vsel %vm4884_vm3, %v3855_v24, %v2480_v35 }
  0xe5   : > { %v5844_v14 = vpop.f32.mrf.mxu0  ;;  %v5846_v44 = vpop.f32.mrf.mxu1  ;;  %4534 = vmatmul.mubr.msk.bf16.gmra.mxu1 %vm496_vm2, %v5600_v38  ;;  %4574 = vmatmul.mubr.msk.bf16.gmra.mxu0 %vm496_vm2, %v5826_v21  ;;  %v2477_v38 = vsel %vm4884_vm3, %v2475_v59, %v2476_v13  ;;  %v2121_v13 = vsel %vm5130_vm6, %v2116_v37, %v2120_v43 }
  0xe6   : > { %4537 = vmatprep.mubr.msk.bf16.mxu1 %vm496_vm2, %v5622_v30  ;;  %4577 = vmatprep.mubr.msk.bf16.mxu0 %vm496_vm2, %v5836_v52  ;;  %v5872_v30 = vcombine.low %v2467_v4, %v2470_v11  ;;  %v5874_v19 = vcombine.low %v2474_v63, %v2477_v38 }
  0xe7   : > { %v5864_v29 = vpop.f32.mrf.mxu0  ;;  %v5866_v47 = vpop.f32.mrf.mxu1 }
  0xe9   : > { %v5868_v36 = vpop.f32.mrf.mxu0  ;;  %v5870_v27 = vpop.f32.mrf.mxu1 }
  0xeb   : > { %v5878_v28 = vpop.f32.mrf.mxu0  ;;  %v5880_v48 = vpop.f32.mrf.mxu1 }
  0xed   : > { %v5882_v41 = vpop.f32.mrf.mxu0  ;;  %v5884_v60 = vpop.f32.mrf.mxu1  ;;  %4538 = vmatmul.mubr.msk.bf16.gmra.mxu1 %vm496_vm2, %v5624_v58  ;;  %4578 = vmatmul.mubr.msk.bf16.gmra.mxu0 %vm496_vm2, %v5872_v30  ;;  %v2484_v58 = vsel %vm4884_vm3, %v2482_v26, %v2483_v50 }
  0xee   : > { %4541 = vmatprep.mubr.msk.bf16.mxu1 %vm496_vm2, %v5645_v56  ;;  %4581 = vmatprep.mubr.msk.bf16.mxu0 %vm496_vm2, %v5874_v19  ;;  %v3819_v56 = vcombine.low %v2111_v54, %v2121_v13  ;;  %v5910_v4 = vcombine.low %v2481_v62, %v2484_v58 }
  0xef   : > { %v5902_v40 = vpop.f32.mrf.mxu0  ;;  %v5904_v46 = vpop.f32.mrf.mxu1 }
  0xf1   : > { %v5906_v59 = vpop.f32.mrf.mxu0  ;;  %v5908_v33 = vpop.f32.mrf.mxu1 }
  0xf3   : > { %v5912_v11 = vpop.f32.mrf.mxu0  ;;  %v5914_v51 = vpop.f32.mrf.mxu1 }
  0xf5   : > { %v5916_v1 = vpop.f32.mrf.mxu0  ;;  %v5918_v63 = vpop.f32.mrf.mxu1  ;;  %4542 = vmatmul.mubr.msk.bf16.gmra.mxu1 %vm496_vm2, %v3819_v56  ;;  %4582 = vmatmul.mubr.msk.bf16.gmra.mxu0 %vm496_vm2, %v5910_v4 }
  0xf6   : > { %4593 = vmatprep.mubr.msk.bf16.mxu1 %vm496_vm2, %v5305_v32  ;;  %4633 = vmatprep.mubr.msk.bf16.mxu0 %vm496_vm2, %v5677_v10 }
  0xf7   : > { %v5927_v34 = vpop.f32.mrf.mxu0  ;;  %v5929_v38 = vpop.f32.mrf.mxu1 }
  0xf9   : > { %v5931_v2 = vpop.f32.mrf.mxu0  ;;  %v5933_v17 = vpop.f32.mrf.mxu1 }
  0xfb   : > { %v5935_v49 = vpop.f32.mrf.mxu0  ;;  %v5937_v35 = vpop.f32.mrf.mxu1 }
  0xfd   : > { %v4355_v31 = vpop.f32.mrf.mxu1  ;;  %v4395_v18 = vpop.f32.mrf.mxu0  ;;  %4594 = vmatmul.mubr.msk.bf16.vlgmr.msra.gmra.mxu1 %vm496_vm2, %v5677_v10  ;;  %4634 = vmatmul.mubr.msk.bf16.vlgmr.msra.gmra.mxu0 %vm496_vm2, %v5713_v25 }
  0xfe   : > { %v781_v32 = vadd.f32 %v4355_v31, %v5799_v6  ;;  %4597 = vmatprep.mubr.msk.bf16.mxu1 %vm496_vm2, %v5713_v25  ;;  %4637 = vmatprep.mubr.msk.bf16.mxu0 %vm496_vm2, %v5715_v55 }
  0xff   : > { %v772_v24 = vpop.f32.mrf.mxu1  ;;  %v974_v37 = vpop.f32.mrf.mxu0 }
 0x100   : > { %v5948_v43 = vadd.f32 %v4395_v18, %v781_v32  ;;  %v773_v26 = vadd.f32 %v772_v24, %v5818_v0 }
 0x101   : > { %v4356_v50 = vpop.f32.mrf.mxu1  ;;  %v4396_v62 = vpop.f32.mrf.mxu0 }
 0x102   : > { %v5951_v10 = vadd.f32 %v974_v37, %v773_v26  ;;  %v784_v54 = vadd.f32 %v4356_v50, %v5830_v42 }
 0x103   : > { %v775_v13 = vpop.f32.mrf.mxu1  ;;  %v977_v6 = vpop.f32.mrf.mxu0 }
 0x104   : > { %v5954_v58 = vadd.f32 %v4396_v62, %v784_v54  ;;  %v776_v25 = vadd.f32 %v775_v13, %v5838_v57 }
 0x105   : > { %v4359_v56 = vpop.f32.mrf.mxu1  ;;  %v4399_v31 = vpop.f32.mrf.mxu0  ;;  %4598 = vmatmul.mubr.msk.bf16.gmra.mxu1 %vm496_vm2, %v5715_v55  ;;  %4638 = vmatmul.mubr.msk.bf16.gmra.mxu0 %vm496_vm2, %v5745_v53 }
 0x106   : > { %v5961_v0 = vadd.f32 %v977_v6, %v776_v25  ;;  %v797_v18 = vadd.f32 %v4359_v56, %v5844_v14  ;;  %4601 = vmatprep.mubr.msk.bf16.mxu1 %vm496_vm2, %v5745_v53  ;;  %4641 = vmatprep.mubr.msk.bf16.mxu0 %vm496_vm2, %v5747_v15 }
 0x107   : > { %v788_v42 = vpop.f32.mrf.mxu1  ;;  %v990_v57 = vpop.f32.mrf.mxu0 }
 0x108   : > { %v5968_v32 = vadd.f32 %v4399_v31, %v797_v18  ;;  %v789_v24 = vadd.f32 %v788_v42, %v5864_v29 }
 0x109   : > { %v4360_v55 = vpop.f32.mrf.mxu1  ;;  %v4400_v37 = vpop.f32.mrf.mxu0 }
 0x10a   : > { %v5971_v26 = vadd.f32 %v990_v57, %v789_v24  ;;  %v800_v50 = vadd.f32 %v4360_v55, %v5868_v36 }
 0x10b   : > { %v791_v62 = vpop.f32.mrf.mxu1  ;;  %v993_v14 = vpop.f32.mrf.mxu0 }
 0x10c   : > { %v5974_v54 = vadd.f32 %v4400_v37, %v800_v50  ;;  %v792_v53 = vadd.f32 %v791_v62, %v5878_v28 }
 0x10d   : > { %v4363_v13 = vpop.f32.mrf.mxu1  ;;  %v4403_v6 = vpop.f32.mrf.mxu0  ;;  %4602 = vmatmul.mubr.msk.bf16.gmra.mxu1 %vm496_vm2, %v5747_v15  ;;  %4642 = vmatmul.mubr.msk.bf16.gmra.mxu0 %vm496_vm2, %v5770_v20 }
 0x10e   : > { %v5981_v29 = vadd.f32 %v993_v14, %v792_v53  ;;  %v813_v25 = vadd.f32 %v4363_v13, %v5882_v41  ;;  %4605 = vmatprep.mubr.msk.bf16.mxu1 %vm496_vm2, %v5770_v20  ;;  %4645 = vmatprep.mubr.msk.bf16.mxu0 %vm496_vm2, %v5772_v39 }
 0x10f   : > { %v804_v36 = vpop.f32.mrf.mxu1  ;;  %v1006_v28 = vpop.f32.mrf.mxu0 }
 0x110   : > { %v5988_v56 = vadd.f32 %v4403_v6, %v813_v25  ;;  %v805_v31 = vadd.f32 %v804_v36, %v5902_v40 }
 0x111   : > { %v4364_v15 = vpop.f32.mrf.mxu1  ;;  %v4404_v18 = vpop.f32.mrf.mxu0 }
 0x112   : > { %v5991_v42 = vadd.f32 %v1006_v28, %v805_v31  ;;  %v816_v57 = vadd.f32 %v4364_v15, %v5906_v59 }
 0x113   : > { %v807_v24 = vpop.f32.mrf.mxu1  ;;  %v1009_v41 = vpop.f32.mrf.mxu0 }
 0x114   : > { %v5994_v55 = vadd.f32 %v4404_v18, %v816_v57  ;;  %v808_v20 = vadd.f32 %v807_v24, %v5912_v11  ;;  %v4780_v57 = vld [vmem:[%s5076_s7 + $0x4] sm:$0xf] }
 0x115   : > { %v4367_v37 = vpop.f32.mrf.mxu1  ;;  %v4407_v50 = vpop.f32.mrf.mxu0  ;;  %4606 = vmatmul.mubr.msk.bf16.gmra.mxu1 %vm496_vm2, %v5772_v39  ;;  %4646 = vmatmul.mubr.msk.bf16.gmra.mxu0 %vm496_vm2, %v5435_v22  ;;  %v2810_v24 = vrot.slane %v4780_v57, 5 }
 0x116   : > { %v6001_v40 = vadd.f32 %v1009_v41, %v808_v20  ;;  %v829_v62 = vadd.f32 %v4367_v37, %v5916_v1  ;;  %4609 = vmatprep.mubr.msk.bf16.mxu1 %vm496_vm2, %v5435_v22  ;;  %4649 = vmatprep.mubr.msk.bf16.mxu0 %vm496_vm2, %v5792_v45 }
 0x117   : > { %v820_v59 = vpop.f32.mrf.mxu1  ;;  %v1022_v11 = vpop.f32.mrf.mxu0 }
 0x118   : > { %v6008_v14 = vadd.f32 %v4407_v50, %v829_v62  ;;  %v821_v53 = vadd.f32 %v820_v59, %v5927_v34 }
 0x119   : > { %v4368_v39 = vpop.f32.mrf.mxu1  ;;  %v4408_v13 = vpop.f32.mrf.mxu0 }
 0x11a   : > { %v6011_v6 = vadd.f32 %v1022_v11, %v821_v53  ;;  %v832_v25 = vadd.f32 %v4368_v39, %v5931_v2  ;;  %v2812_v53 = vrot.slane %v2810_v24, 4  ;;  %v2813_v39 = vrot.slane %v5603_v61, 5 }
 0x11b   : > { %v823_v1 = vpop.f32.mrf.mxu1  ;;  %v1025_v36 = vpop.f32.mrf.mxu0 }
 0x11c   : > { %v6014_v28 = vadd.f32 %v4408_v13, %v832_v25  ;;  %v824_v22 = vadd.f32 %v823_v1, %v5935_v49 }
 0x11d   : > { %v4371_v31 = vpop.f32.mrf.mxu1  ;;  %v4411_v15 = vpop.f32.mrf.mxu0  ;;  %4610 = vmatmul.mubr.msk.bf16.gmra.mxu1 %vm496_vm2, %v5792_v45  ;;  %4650 = vmatmul.mubr.msk.bf16.gmra.mxu0 %vm496_vm2, %v5826_v21 }
 0x11e   : > { %v6021_v34 = vadd.f32 %v1025_v36, %v824_v22  ;;  %v845_v18 = vadd.f32 %v4371_v31, %v5801_v23  ;;  %4613 = vmatprep.mubr.msk.bf16.mxu1 %vm496_vm2, %v5826_v21  ;;  %4653 = vmatprep.mubr.msk.bf16.mxu0 %vm496_vm2, %v5836_v52  ;;  %v4781_v21 = vld [vmem:[%s5076_s7] sm:$0xf] }
 0x11f   : > { %v836_v2 = vpop.f32.mrf.mxu1  ;;  %v1038_v49 = vpop.f32.mrf.mxu0  ;;  %v3900_v11 = vrot.slane %v4781_v21, 9 }
 0x120   : > { %v6029_v41 = vadd.f32 %v4411_v15, %v845_v18  ;;  %v837_v45 = vadd.f32 %v836_v2, %v5820_v12 }
 0x121   : > { %v4372_v20 = vpop.f32.mrf.mxu1  ;;  %v4412_v37 = vpop.f32.mrf.mxu0  ;;  %v2811_v22 = vsel %vm4884_vm3, %v3900_v11, %v2810_v24 }
 0x122   : > { %v6032_v50 = vadd.f32 %v1038_v49, %v837_v45  ;;  %v848_v23 = vadd.f32 %v4372_v20, %v5832_v7 }
 0x123   : > { %v839_v62 = vpop.f32.mrf.mxu1  ;;  %v1041_v59 = vpop.f32.mrf.mxu0 }
 0x124   : > { %v6037_v13 = vadd.f32 %v4412_v37, %v848_v23  ;;  %v840_v25 = vadd.f32 %v839_v62, %v5840_v16 }
 0x125   : > { %v4375_v1 = vpop.f32.mrf.mxu1  ;;  %v4415_v36 = vpop.f32.mrf.mxu0  ;;  %4614 = vmatmul.mubr.msk.bf16.gmra.mxu1 %vm496_vm2, %v5836_v52  ;;  %4654 = vmatmul.mubr.msk.bf16.gmra.mxu0 %vm496_vm2, %v5872_v30  ;;  %v2814_v52 = vsel %vm4884_vm3, %v2812_v53, %v2813_v39 }
 0x126   : > { %v6044_v12 = vadd.f32 %v1041_v59, %v840_v25  ;;  %v861_v7 = vadd.f32 %v4375_v1, %v5846_v44  ;;  %4617 = vmatprep.mubr.msk.bf16.mxu1 %vm496_vm2, %v5872_v30  ;;  %4657 = vmatprep.mubr.msk.bf16.mxu0 %vm496_vm2, %v5874_v19  ;;  %v3909_v49 = vcombine.low %v2811_v22, %v2814_v52 }
 0x127   : > { %v852_v61 = vpop.f32.mrf.mxu1  ;;  %v1054_v16 = vpop.f32.mrf.mxu0 }
 0x128   : > { %v6055_v31 = vadd.f32 %v4415_v36, %v861_v7  ;;  %v853_v15 = vadd.f32 %v852_v61, %v5866_v47 }
 0x129   : > { %v4376_v18 = vpop.f32.mrf.mxu1  ;;  %v4416_v44 = vpop.f32.mrf.mxu0 }
 0x12a   : > { %v6058_v2 = vadd.f32 %v1054_v16, %v853_v15  ;;  %v864_v30 = vadd.f32 %v4376_v18, %v5870_v27 }
 0x12b   : > { %v855_v57 = vpop.f32.mrf.mxu1  ;;  %v1057_v45 = vpop.f32.mrf.mxu0 }
 0x12c   : > { %v6061_v20 = vadd.f32 %v4416_v44, %v864_v30  ;;  %v856_v24 = vadd.f32 %v855_v57, %v5880_v48 }
 0x12d   : > { %v4379_v37 = vpop.f32.mrf.mxu1  ;;  %v4419_v8 = vpop.f32.mrf.mxu0  ;;  %4618 = vmatmul.mubr.msk.bf16.gmra.mxu1 %vm496_vm2, %v5874_v19  ;;  %4658 = vmatmul.mubr.msk.bf16.gmra.mxu0 %vm496_vm2, %v5910_v4 }
 0x12e   : > { %v6068_v47 = vadd.f32 %v1057_v45, %v856_v24  ;;  %v877_v23 = vadd.f32 %v4379_v37, %v5884_v60  ;;  %4621 = vmatprep.mubr.msk.bf16.mxu1 %vm496_vm2, %v5910_v4  ;;  %4661 = vmatprep.mubr.msk.bf16.mxu0 %vm496_vm2, %v3909_v49 }
 0x12f   : > { %v868_v27 = vpop.f32.mrf.mxu1  ;;  %v1070_v62 = vpop.f32.mrf.mxu0 }
 0x130   : > { %v6074_v48 = vadd.f32 %v4419_v8, %v877_v23  ;;  %v869_v59 = vadd.f32 %v868_v27, %v5904_v46 }
 0x131   : > { %v4380_v21 = vpop.f32.mrf.mxu1  ;;  %v4420_v19 = vpop.f32.mrf.mxu0 }
 0x132   : > { %v6077_v11 = vadd.f32 %v1070_v62, %v869_v59  ;;  %v880_v53 = vadd.f32 %v4380_v21, %v5908_v33 }
 0x133   : > { %v871_v39 = vpop.f32.mrf.mxu1  ;;  %v1073_v25 = vpop.f32.mrf.mxu0 }
 0x134   : > { %v6080_v60 = vadd.f32 %v4420_v19, %v880_v53  ;;  %v872_v4 = vadd.f32 %v871_v39, %v5914_v51 }
 0x135   : > { %v4383_v1 = vpop.f32.mrf.mxu1  ;;  %v4423_v36 = vpop.f32.mrf.mxu0  ;;  %4622 = vmatmul.mubr.msk.bf16.gmra.mxu1 %vm496_vm2, %v3909_v49  ;;  %4662 = vmatmul.mubr.msk.bf16.gmra.mxu0 %vm496_vm2, %v3939_v5 }
 0x136   : > { %v6088_v46 = vadd.f32 %v1073_v25, %v872_v4  ;;  %v893_v7 = vadd.f32 %v4383_v1, %v5918_v63 }
 0x137   : > { %v884_v33 = vpop.f32.mrf.mxu1  ;;  %v1086_v61 = vpop.f32.mrf.mxu0 }
 0x138   : > { %v6091_v16 = vadd.f32 %v4423_v36, %v893_v7  ;;  %v885_v22 = vadd.f32 %v884_v33, %v5929_v38 }
 0x139   : > { %v4384_v51 = vpop.f32.mrf.mxu1  ;;  %v4424_v52 = vpop.f32.mrf.mxu0 }
 0x13a   : > { %v6094_v15 = vadd.f32 %v1086_v61, %v885_v22  ;;  %v896_v18 = vadd.f32 %v4384_v51, %v5933_v17 }
 0x13b   : > { %v887_v44 = vpop.f32.mrf.mxu1  ;;  %v1089_v3 = vpop.f32.mrf.mxu0 }
 0x13c   : > { %v6097_v9 = vadd.f32 %v4424_v52, %v896_v18  ;;  %v888_v5 = vadd.f32 %v887_v44, %v5937_v35 }
 0x13d   : > { %v4435_v30 = vpop.f32.mrf.mxu1  ;;  %v4475_v63 = vpop.f32.mrf.mxu0 }
 0x13e   : > { %v6100_v49 = vadd.f32 %v1089_v3, %v888_v5  ;;  %v1812_v57 = vadd.f32 %v4435_v30, %v5948_v43 }
 0x13f   : > { %v1683_v45 = vpop.f32.mrf.mxu1  ;;  %v1939_v38 = vpop.f32.mrf.mxu0 }
 0x140   : > { %v6103_v24 = vadd.f32 %v4475_v63, %v1812_v57  ;;  %v1810_v37 = vadd.f32 %v1683_v45, %v5951_v10 }
 0x141   : > { %v4436_v8 = vpop.f32.mrf.mxu1  ;;  %v4476_v17 = vpop.f32.mrf.mxu0 }
 0x142   : > { %v6106_v23 = vadd.f32 %v1939_v38, %v1810_v37  ;;  %v1813_v27 = vadd.f32 %v4436_v8, %v5954_v58 }
 0x143   : > { %v1686_v62 = vpop.f32.mrf.mxu1  ;;  %v1942_v35 = vpop.f32.mrf.mxu0 }
 0x144   : > { %v6109_v59 = vadd.f32 %v4476_v17, %v1813_v27  ;;  %v1811_v21 = vadd.f32 %v1686_v62, %v5961_v0 }
 0x145   : > { %v4439_v19 = vpop.f32.mrf.mxu1  ;;  %v4479_v43 = vpop.f32.mrf.mxu0 }
 0x146   : > { %v6112_v53 = vadd.f32 %v1942_v35, %v1811_v21  ;;  %v1816_v39 = vadd.f32 %v4439_v19, %v5968_v32 }
 0x147   : > { %v1699_v25 = vpop.f32.mrf.mxu1  ;;  %v1955_v10 = vpop.f32.mrf.mxu0 }
 0x148   : > { %v6115_v4 = vadd.f32 %v4479_v43, %v1816_v39  ;;  %v1814_v1 = vadd.f32 %v1699_v25, %v5971_v26 }
 0x149   : > { %v4440_v36 = vpop.f32.mrf.mxu1  ;;  %v4480_v58 = vpop.f32.mrf.mxu0 }
 0x14a   : > { %v6118_v7 = vadd.f32 %v1955_v10, %v1814_v1  ;;  %v1817_v33 = vadd.f32 %v4440_v36, %v5974_v54 }
 0x14b   : > { %v1702_v61 = vpop.f32.mrf.mxu1  ;;  %v1958_v0 = vpop.f32.mrf.mxu0 }
 0x14c   : > { %v6121_v22 = vadd.f32 %v4480_v58, %v1817_v33  ;;  %v1815_v51 = vadd.f32 %v1702_v61, %v5981_v29 }
 0x14d   : > { %v4443_v52 = vpop.f32.mrf.mxu1  ;;  %v4483_v32 = vpop.f32.mrf.mxu0 }
 0x14e   : > { %v6124_v18 = vadd.f32 %v1958_v0, %v1815_v51  ;;  %v1820_v44 = vadd.f32 %v4443_v52, %v5988_v56 }
 0x14f   : > { %v1715_v3 = vpop.f32.mrf.mxu1  ;;  %v1971_v26 = vpop.f32.mrf.mxu0 }
 0x150   : > { %v6127_v5 = vadd.f32 %v4483_v32, %v1820_v44  ;;  %v1818_v30 = vadd.f32 %v1715_v3, %v5991_v42 }
 0x151   : > { %v4444_v63 = vpop.f32.mrf.mxu1  ;;  %v4484_v54 = vpop.f32.mrf.mxu0 }
 0x152   : > { %v6130_v57 = vadd.f32 %v1971_v26, %v1818_v30  ;;  %v1821_v45 = vadd.f32 %v4444_v63, %v5994_v55 }
 0x153   : > { %v1718_v38 = vpop.f32.mrf.mxu1  ;;  %v1974_v29 = vpop.f32.mrf.mxu0 }
 0x154   : > { %v6133_v37 = vadd.f32 %v4484_v54, %v1821_v45  ;;  %v1819_v8 = vadd.f32 %v1718_v38, %v6001_v40 }
 0x155   : > { %v4447_v17 = vpop.f32.mrf.mxu1  ;;  %v4487_v56 = vpop.f32.mrf.mxu0 }
 0x156   : > { %v6136_v27 = vadd.f32 %v1974_v29, %v1819_v8  ;;  %v1824_v62 = vadd.f32 %v4447_v17, %v6008_v14 }
 0x157   : > { %v1731_v35 = vpop.f32.mrf.mxu1  ;;  %v1987_v42 = vpop.f32.mrf.mxu0 }
 0x158   : > { %v6139_v21 = vadd.f32 %v4487_v56, %v1824_v62  ;;  %v1822_v19 = vadd.f32 %v1731_v35, %v6011_v6 }
 0x159   : > { %v4448_v43 = vpop.f32.mrf.mxu1  ;;  %v4488_v55 = vpop.f32.mrf.mxu0 }
 0x15a   : > { %v6142_v39 = vadd.f32 %v1987_v42, %v1822_v19  ;;  %v1825_v25 = vadd.f32 %v4448_v43, %v6014_v28 }
 0x15b   : > { %v1734_v10 = vpop.f32.mrf.mxu1  ;;  %v1990_v40 = vpop.f32.mrf.mxu0 }
 0x15c   : > { %v6145_v1 = vadd.f32 %v4488_v55, %v1825_v25  ;;  %v1823_v36 = vadd.f32 %v1734_v10, %v6021_v34 }
 0x15d   : > { %v4451_v58 = vpop.f32.mrf.mxu1  ;;  %v4491_v14 = vpop.f32.mrf.mxu0 }
 0x15e   : > { %v6148_v33 = vadd.f32 %v1990_v40, %v1823_v36  ;;  %v1828_v61 = vadd.f32 %v4451_v58, %v6029_v41 }
 0x15f   : > { %v1747_v0 = vpop.f32.mrf.mxu1  ;;  %v2003_v6 = vpop.f32.mrf.mxu0 }
 0x160   : > { %v6151_v51 = vadd.f32 %v4491_v14, %v1828_v61  ;;  %v1826_v52 = vadd.f32 %v1747_v0, %v6032_v50 }
 0x161   : > { %v4452_v32 = vpop.f32.mrf.mxu1  ;;  %v4492_v28 = vpop.f32.mrf.mxu0 }
 0x162   : > { %v6154_v44 = vadd.f32 %v2003_v6, %v1826_v52  ;;  %v1829_v3 = vadd.f32 %v4452_v32, %v6037_v13 }
 0x163   : > { %v1750_v26 = vpop.f32.mrf.mxu1  ;;  %v2006_v34 = vpop.f32.mrf.mxu0 }
 0x164   : > { %v6157_v30 = vadd.f32 %v4492_v28, %v1829_v3  ;;  %v1827_v63 = vadd.f32 %v1750_v26, %v6044_v12 }
 0x165   : > { %v4455_v54 = vpop.f32.mrf.mxu1  ;;  %v4495_v41 = vpop.f32.mrf.mxu0 }
 0x166   : > { %v6160_v45 = vadd.f32 %v2006_v34, %v1827_v63  ;;  %v1832_v38 = vadd.f32 %v4455_v54, %v6055_v31 }
 0x167   : > { %v1763_v29 = vpop.f32.mrf.mxu1  ;;  %v2019_v50 = vpop.f32.mrf.mxu0 }
 0x168   : > { %v6163_v8 = vadd.f32 %v4495_v41, %v1832_v38  ;;  %v1830_v17 = vadd.f32 %v1763_v29, %v6058_v2 }
 0x169   : > { %v4456_v56 = vpop.f32.mrf.mxu1  ;;  %v4496_v13 = vpop.f32.mrf.mxu0 }
 0x16a   : > { %v6166_v62 = vadd.f32 %v2019_v50, %v1830_v17  ;;  %v1833_v35 = vadd.f32 %v4456_v56, %v6061_v20 }
 0x16b   : > { %v1766_v42 = vpop.f32.mrf.mxu1  ;;  %v2022_v12 = vpop.f32.mrf.mxu0 }
 0x16c   : > { %v6169_v19 = vadd.f32 %v4496_v13, %v1833_v35  ;;  %v1831_v43 = vadd.f32 %v1766_v42, %v6068_v47 }
 0x16d   : > { %v4459_v55 = vpop.f32.mrf.mxu1  ;;  %v4499_v31 = vpop.f32.mrf.mxu0 }
 0x16e   : > { %v6172_v25 = vadd.f32 %v2022_v12, %v1831_v43  ;;  %v1836_v10 = vadd.f32 %v4459_v55, %v6074_v48 }
 0x16f   : > { %v1779_v40 = vpop.f32.mrf.mxu1  ;;  %v2035_v2 = vpop.f32.mrf.mxu0 }
 0x170   : > { %v6175_v36 = vadd.f32 %v4499_v31, %v1836_v10  ;;  %v1834_v58 = vadd.f32 %v1779_v40, %v6077_v11 }
 0x171   : > { %v4460_v14 = vpop.f32.mrf.mxu1  ;;  %v4500_v20 = vpop.f32.mrf.mxu0 }
 0x172   : > { %v6178_v61 = vadd.f32 %v2035_v2, %v1834_v58  ;;  %v1837_v0 = vadd.f32 %v4460_v14, %v6080_v60 }
 0x173   : > { %v1782_v6 = vpop.f32.mrf.mxu1  ;;  %v2038_v47 = vpop.f32.mrf.mxu0 }
 0x174   : > { %v6181_v52 = vadd.f32 %v4500_v20, %v1837_v0  ;;  %v1835_v32 = vadd.f32 %v1782_v6, %v6088_v46 }
 0x175   : > { %v4463_v28 = vpop.f32.mrf.mxu1  ;;  %v4503_v48 = vpop.f32.mrf.mxu0 }
 0x176   : > { %6490 = vst [vmem:[#allocation2_spill] sm:$0xff] %v6181_v52  ;;  %v6184_v3 = vadd.f32 %v2038_v47, %v1835_v32  ;;  %v1840_v26 = vadd.f32 %v4463_v28, %v6091_v16 }
 0x177   : > { %v1795_v34 = vpop.f32.mrf.mxu1  ;;  %v2051_v11 = vpop.f32.mrf.mxu0 }
 0x178   : > { %6491 = vst [vmem:[#allocation3_spill] sm:$0xff] %v6184_v3  ;;  %v6187_v63 = vadd.f32 %v4503_v48, %v1840_v26  ;;  %v1838_v54 = vadd.f32 %v1795_v34, %v6094_v15 }
 0x179   : > { %v4464_v41 = vpop.f32.mrf.mxu1  ;;  %v4504_v60 = vpop.f32.mrf.mxu0 }
 0x17a   : > { %v6190_v38 = vadd.f32 %v2051_v11, %v1838_v54  ;;  %v1841_v29 = vadd.f32 %v4464_v41, %v6097_v9 }
 0x17b   : > { %v1798_v50 = vpop.f32.mrf.mxu1  ;;  %v2054_v46 = vpop.f32.mrf.mxu0 }
 0x17c   : > { %v6193_v17 = vadd.f32 %v4504_v60, %v1841_v29  ;;  %v1839_v56 = vadd.f32 %v1798_v50, %v6100_v49 }
 0x17d   : > { %v4515_v13 = vpop.f32.mrf.mxu1  ;;  %v4555_v16 = vpop.f32.mrf.mxu0 }
 0x17e   : > { %6492 = vst [vmem:[#allocation4_spill] sm:$0xff] %v6193_v17  ;;  %v6196_v35 = vadd.f32 %v2054_v46, %v1839_v56  ;;  %v2324_v42 = vadd.f32 %v4515_v13, %v6103_v24 }
 0x17f   : > { %v2195_v12 = vpop.f32.mrf.mxu1  ;;  %v2648_v15 = vpop.f32.mrf.mxu0 }
 0x180   : > { %6493 = vst [vmem:[#allocation9_spill] sm:$0xff] %v6196_v35  ;;  %v6199_v43 = vadd.f32 %v4555_v16, %v2324_v42  ;;  %v2322_v55 = vadd.f32 %v2195_v12, %v6106_v23 }
 0x181   : > { %v6202_v31 = vpop.f32.mrf.mxu1  ;;  %v6204_v9 = vpop.f32.mrf.mxu0 }
 0x182   : > { %v6206_v10 = vadd.f32 %v2648_v15, %v2322_v55 }
 0x183   : > { %v6208_v40 = vpop.f32.mrf.mxu1  ;;  %v6210_v49 = vpop.f32.mrf.mxu0 }
 0x185   : > { %v4519_v2 = vpop.f32.mrf.mxu1  ;;  %v4559_v58 = vpop.f32.mrf.mxu0 }
 0x186   : > { %v2328_v24 = vadd.f32 %v4519_v2, %v6115_v4 }
 0x187   : > { %v2211_v14 = vpop.f32.mrf.mxu1  ;;  %v2664_v20 = vpop.f32.mrf.mxu0 }
 0x188   : > { %v6213_v0 = vadd.f32 %v4559_v58, %v2328_v24  ;;  %v2326_v23 = vadd.f32 %v2211_v14, %v6118_v7 }
 0x189   : > { %v6216_v6 = vpop.f32.mrf.mxu1  ;;  %v6218_v47 = vpop.f32.mrf.mxu0 }
 0x18a   : > { %v6220_v32 = vadd.f32 %v2664_v20, %v2326_v23 }
 0x18b   : > { %v6222_v28 = vpop.f32.mrf.mxu1  ;;  %v6224_v48 = vpop.f32.mrf.mxu0 }
 0x18d   : > { %v4523_v26 = vpop.f32.mrf.mxu1  ;;  %v4563_v34 = vpop.f32.mrf.mxu0 }
 0x18e   : > { %v2332_v4 = vadd.f32 %v4523_v26, %v6127_v5 }
 0x18f   : > { %v2227_v11 = vpop.f32.mrf.mxu1  ;;  %v2680_v54 = vpop.f32.mrf.mxu0 }
 0x190   : > { %v6227_v41 = vadd.f32 %v4563_v34, %v2332_v4  ;;  %v2330_v7 = vadd.f32 %v2227_v11, %v6130_v57 }
 0x191   : > { %v6230_v60 = vpop.f32.mrf.mxu1  ;;  %v6232_v29 = vpop.f32.mrf.mxu0 }
 0x192   : > { %v6234_v50 = vadd.f32 %v2680_v54, %v2330_v7 }
 0x193   : > { %v6236_v46 = vpop.f32.mrf.mxu1  ;;  %v6238_v56 = vpop.f32.mrf.mxu0 }
 0x195   : > { %v4527_v13 = vpop.f32.mrf.mxu1  ;;  %v4567_v16 = vpop.f32.mrf.mxu0 }
 0x196   : > { %v2336_v5 = vadd.f32 %v4527_v13, %v6139_v21 }
 0x197   : > { %v2243_v42 = vpop.f32.mrf.mxu1  ;;  %v2696_v12 = vpop.f32.mrf.mxu0 }
 0x198   : > { %v6241_v15 = vadd.f32 %v4567_v16, %v2336_v5  ;;  %v2334_v57 = vadd.f32 %v2243_v42, %v6142_v39 }
 0x199   : > { %v6244_v55 = vpop.f32.mrf.mxu1  ;;  %v6246_v2 = vpop.f32.mrf.mxu0 }
 0x19a   : > { %v6248_v58 = vadd.f32 %v2696_v12, %v2334_v57 }
 0x19b   : > { %v6250_v24 = vpop.f32.mrf.mxu1  ;;  %v6252_v14 = vpop.f32.mrf.mxu0 }
 0x19d   : > { %v4531_v20 = vpop.f32.mrf.mxu1  ;;  %v4571_v23 = vpop.f32.mrf.mxu0 }
 0x19e   : > { %v2340_v21 = vadd.f32 %v4531_v20, %v6151_v51 }
 0x19f   : > { %v2259_v26 = vpop.f32.mrf.mxu1  ;;  %v2712_v34 = vpop.f32.mrf.mxu0 }
 0x1a0   : > { %v6255_v4 = vadd.f32 %v4571_v23, %v2340_v21  ;;  %v2338_v39 = vadd.f32 %v2259_v26, %v6154_v44 }
 0x1a1   : > { %v6258_v11 = vpop.f32.mrf.mxu1  ;;  %v6260_v54 = vpop.f32.mrf.mxu0 }
 0x1a2   : > { %v6262_v7 = vadd.f32 %v2712_v34, %v2338_v39 }
 0x1a3   : > { %v6264_v13 = vpop.f32.mrf.mxu1  ;;  %v6266_v16 = vpop.f32.mrf.mxu0 }
 0x1a5   : > { %v4535_v5 = vpop.f32.mrf.mxu1  ;;  %v4575_v42 = vpop.f32.mrf.mxu0 }
 0x1a6   : > { %v2344_v51 = vadd.f32 %v4535_v5, %v6163_v8 }
 0x1a7   : > { %v2275_v12 = vpop.f32.mrf.mxu1  ;;  %v2728_v57 = vpop.f32.mrf.mxu0 }
 0x1a8   : > { %v6269_v20 = vadd.f32 %v4575_v42, %v2344_v51  ;;  %v2342_v44 = vadd.f32 %v2275_v12, %v6166_v62 }
 0x1a9   : > { %v6272_v23 = vpop.f32.mrf.mxu1  ;;  %v6274_v21 = vpop.f32.mrf.mxu0 }
 0x1aa   : > { %6494 = vst [vmem:[#allocation5_spill] sm:$0xff] %v6274_v21  ;;  %v6276_v26 = vadd.f32 %v2728_v57, %v2342_v44 }
 0x1ab   : > { %v6278_v34 = vpop.f32.mrf.mxu1  ;;  %v6280_v39 = vpop.f32.mrf.mxu0 }
 0x1ac   : > { %6495 = vst [vmem:[#allocation6_spill] sm:$0xff] %v6276_v26  ;;  %6496 = vst [vmem:[#allocation7_spill] sm:$0xff] %v6280_v39 }
 0x1ad   : > { %v4539_v35 = vpop.f32.mrf.mxu1  ;;  %v4579_v17 = vpop.f32.mrf.mxu0 }
 0x1ae   : > { %v2348_v8 = vadd.f32 %v4539_v35, %v6175_v36 }
 0x1af   : > { %v2291_v5 = vpop.f32.mrf.mxu1  ;;  %v2744_v3 = vpop.f32.mrf.mxu0 }
 0x1b0   : > { %v6283_v42 = vadd.f32 %v4579_v17, %v2348_v8  ;;  %v2346_v62 = vadd.f32 %v2291_v5, %v6178_v61 }
 0x1b1   : > { %v6286_v51 = vpop.f32.mrf.mxu1  ;;  %v6288_v12 = vpop.f32.mrf.mxu0 }
 0x1b2   : > { %v6290_v57 = vadd.f32 %v2744_v3, %v2346_v62 }
 0x1b3   : > { %v6292_v44 = vpop.f32.mrf.mxu1  ;;  %v6294_v52 = vpop.f32.mrf.mxu0 }
 0x1b4   : > { %6497 = vst [vmem:[#allocation8_spill] sm:$0xff] %v6290_v57  ;;  %6498 = vst [vmem:[#allocation10_spill] sm:$0xff] %v6294_v52  ;;  %v2325_v52 = vadd.f32 %v6202_v31, %v6109_v59 }
 0x1b5   : > { %v4543_v39 = vpop.f32.mrf.mxu1  ;;  %v4583_v26 = vpop.f32.mrf.mxu0 }
 0x1b6   : > { %v2352_v36 = vadd.f32 %v4543_v39, %v6187_v63 }
 0x1b7   : > { %v2307_v35 = vpop.f32.mrf.mxu1  ;;  %v2760_v21 = vpop.f32.mrf.mxu0 }
 0x1b8   : > { %v6297_v17 = vadd.f32 %v4583_v26, %v2352_v36  ;;  %v2350_v61 = vadd.f32 %v2307_v35, %v6190_v38  ;;  %v2323_v26 = vadd.f32 %v6208_v40, %v6112_v53 }
 0x1b9   : > { %v6300_v8 = vpop.f32.mrf.mxu1  ;;  %v6302_v5 = vpop.f32.mrf.mxu0 }
 0x1ba   : > { %6499 = vst [vmem:[#allocation11_spill] sm:$0xff] %v6297_v17  ;;  %6500 = vst [vmem:[#allocation12_spill] sm:$0xff] %v6302_v5  ;;  %v6304_v3 = vadd.f32 %v2760_v21, %v2350_v61  ;;  %v2778_v5 = vadd.f32 %v6204_v9, %v2325_v52 }
 0x1bb   : > { %v6306_v62 = vpop.f32.mrf.mxu1  ;;  %v6308_v57 = vpop.f32.mrf.mxu0 }
 0x1bc   : > { %6501 = vst [vmem:[#allocation13_spill] sm:$0xff] %v6304_v3  ;;  %6502 = vst [vmem:[#allocation14_spill] sm:$0xff] %v6306_v62  ;;  %v2776_v3 = vadd.f32 %v6210_v49, %v2323_v26 }
 0x1bd   : > { %6503 = vst [vmem:[#allocation15_spill] sm:$0xff] %v6308_v57  ;;  %v4595_v63 = vpop.f32.mrf.mxu1  ;;  %v4635_v39 = vpop.f32.mrf.mxu0  ;;  %v6320_v57 = vld [vmem:[%s6445_s3] ss:$0 sm:$0xff] }
 0x1be   : > { %v3017_v38 = vadd.f32 %v4595_v63, %v6199_v43 }
 0x1bf   : > { %v2888_v36 = vpop.f32.mrf.mxu1  ;;  %v3128_v35 = vpop.f32.mrf.mxu0 }
 0x1c0   : > { %v3257_v21 = vadd.f32 %v4635_v39, %v3017_v38  ;;  %v3015_v61 = vadd.f32 %v2888_v36, %v6206_v10  ;;  %v2329_v10 = vadd.f32 %v6216_v6, %v6121_v22  ;;  %v2327_v39 = vadd.f32 %v6222_v28, %v6124_v18 }
 0x1c1   : > { %v4596_v59 = vpop.f32.mrf.mxu1  ;;  %v4636_v31 = vpop.f32.mrf.mxu0 }
 0x1c2   : > { %v3255_v53 = vadd.f32 %v3128_v35, %v3015_v61  ;;  %v3018_v40 = vadd.f32 %v4596_v59, %v2778_v5  ;;  %v3296_v17 = vadd.f32 %v6320_v57, %v3257_v21  ;;  %v2782_v18 = vadd.f32 %v6218_v47, %v2329_v10 }
 0x1c3   : > { %v2891_v43 = vpop.f32.mrf.mxu1  ;;  %v3131_v63 = vpop.f32.mrf.mxu0  ;;  %v2780_v6 = vadd.f32 %v6224_v48, %v2327_v39  ;;  %v2333_v47 = vadd.f32 %v6230_v60, %v6133_v37 }
 0x1c4   : > { %v3258_v52 = vadd.f32 %v4636_v31, %v3018_v40  ;;  %v3016_v9 = vadd.f32 %v2891_v43, %v2776_v3  ;;  %v3294_v62 = vadd.f32 %v6320_v57, %v3255_v53  ;;  %v3328_v61 = vmax.f32 %v3296_v17, 0.0 }
 0x1c5   : > { %v4599_v38 = vpop.f32.mrf.mxu1  ;;  %v4639_v36 = vpop.f32.mrf.mxu0 }
 0x1c6   : > { %v3297_v49 = vadd.f32 %v6320_v57, %v3258_v52  ;;  %v3256_v5 = vadd.f32 %v3131_v63, %v3016_v9  ;;  %v3021_v26 = vadd.f32 %v4599_v38, %v6213_v0  ;;  %v3326_v17 = vmax.f32 %v3294_v62, 0.0 }
 0x1c7   : > { %v2904_v35 = vpop.f32.mrf.mxu1  ;;  %v3144_v21 = vpop.f32.mrf.mxu0 }
 0x1c8   : > { %v3329_v3 = vmax.f32 %v3297_v49, 0.0  ;;  %v3295_v59 = vadd.f32 %v6320_v57, %v3256_v5  ;;  %v3019_v22 = vadd.f32 %v2904_v35, %v6220_v32  ;;  %v3261_v28 = vadd.f32 %v4639_v36, %v3021_v26 }
 0x1c9   : > { %v4600_v0 = vpop.f32.mrf.mxu1  ;;  %v4640_v31 = vpop.f32.mrf.mxu0  ;;  %v2331_v26 = vadd.f32 %v6236_v46, %v6136_v27 }
 0x1ca   : > { %v4038_v53 = vpack.c.bf16 %v3329_v3, %v3328_v61  ;;  %v3327_v40 = vmax.f32 %v3295_v59, 0.0  ;;  %v3259_v43 = vadd.f32 %v3144_v21, %v3019_v22  ;;  %v3022_v63 = vadd.f32 %v4600_v0, %v2782_v18 }
 0x1cb   : > { %v2907_v32 = vpop.f32.mrf.mxu1  ;;  %v3147_v52 = vpop.f32.mrf.mxu0  ;;  %v3300_v10 = vadd.f32 %v6320_v57, %v3261_v28  ;;  %v2786_v21 = vadd.f32 %v6232_v29, %v2333_v47  ;;  %v2784_v46 = vadd.f32 %v6238_v56, %v2331_v26 }
 0x1cc   : > { %4110 = vst [vmem:[%s6339_s15 + $0x8] sm:$0xff] %v4038_v53   ;;  %v4033_v48 = vpack.c.bf16 %v3327_v40, %v3326_v17  ;;  %v3020_v9 = vadd.f32 %v2907_v32, %v2780_v6  ;;  %v3262_v39 = vadd.f32 %v4640_v31, %v3022_v63  ;;  %v3298_v62 = vadd.f32 %v6320_v57, %v3259_v43 }
 0x1cd   : > { %v4603_v38 = vpop.f32.mrf.mxu1  ;;  %v4643_v36 = vpop.f32.mrf.mxu0  ;;  %v3332_v22 = vmax.f32 %v3300_v10, 0.0  ;;  %v2337_v31 = vadd.f32 %v6244_v55, %v6145_v1 }
 0x1ce   : > { %4034 = vst [vmem:[%s6339_s15] sm:$0xff] %v4033_v48   ;;  %v3260_v49 = vadd.f32 %v3147_v52, %v3020_v9  ;;  %v3025_v5 = vadd.f32 %v4603_v38, %v6227_v41  ;;  %v3301_v35 = vadd.f32 %v6320_v57, %v3262_v39  ;;  %v3330_v41 = vmax.f32 %v3298_v62, 0.0 }
 0x1cf   : > { %v2920_v37 = vpop.f32.mrf.mxu1  ;;  %v3160_v60 = vpop.f32.mrf.mxu0  ;;  %v2335_v48 = vadd.f32 %v6250_v24, %v6148_v33  ;;  %v2790_v55 = vadd.f32 %v6246_v2, %v2337_v31 }
 0x1d0   : > { %v3299_v61 = vadd.f32 %v6320_v57, %v3260_v49  ;;  %v3265_v3 = vadd.f32 %v4643_v36, %v3025_v5  ;;  %v3023_v59 = vadd.f32 %v2920_v37, %v6234_v50  ;;  %v3333_v18 = vmax.f32 %v3301_v35, 0.0 }
 0x1d1   : > { %v4604_v6 = vpop.f32.mrf.mxu1  ;;  %v4644_v28 = vpop.f32.mrf.mxu0  ;;  %v2788_v35 = vadd.f32 %v6252_v14, %v2335_v48 }
 0x1d2   : > { %v3331_v0 = vmax.f32 %v3299_v61, 0.0  ;;  %v3026_v27 = vadd.f32 %v4604_v6, %v2786_v21  ;;  %v4048_v29 = vpack.c.bf16 %v3333_v18, %v3332_v22  ;;  %v3263_v17 = vadd.f32 %v3160_v60, %v3023_v59 }
 0x1d3   : > { %v2923_v53 = vpop.f32.mrf.mxu1  ;;  %v3163_v40 = vpop.f32.mrf.mxu0  ;;  %v3304_v50 = vadd.f32 %v6320_v57, %v3265_v3  ;;  %v2339_v6 = vadd.f32 %v6264_v13, %v6160_v45 }
 0x1d4   : > { %v4043_v43 = vpack.c.bf16 %v3331_v0, %v3330_v41  ;;  %v3266_v63 = vadd.f32 %v4644_v28, %v3026_v27  ;;  %4112 = vst [vmem:[%s6339_s15 + $0x18] sm:$0xff] %v4048_v29   ;;  %v3024_v32 = vadd.f32 %v2923_v53, %v2784_v46  ;;  %v3302_v9 = vadd.f32 %v6320_v57, %v3263_v17 }
 0x1d5   : > { %v4607_v52 = vpop.f32.mrf.mxu1  ;;  %v4647_v47 = vpop.f32.mrf.mxu0  ;;  %v3336_v36 = vmax.f32 %v3304_v50, 0.0  ;;  %v2792_v13 = vadd.f32 %v6266_v16, %v2339_v6 }
 0x1d6   : > { %4111 = vst [vmem:[%s6339_s15 + $0x10] sm:$0xff] %v4043_v43   ;;  %v3305_v56 = vadd.f32 %v6320_v57, %v3266_v63  ;;  %v3029_v1 = vadd.f32 %v4607_v52, %v6241_v15  ;;  %v3264_v10 = vadd.f32 %v3163_v40, %v3024_v32  ;;  %v3334_v60 = vmax.f32 %v3302_v9, 0.0 }
 0x1d7   : > { %v2936_v39 = vpop.f32.mrf.mxu1  ;;  %v3176_v38 = vpop.f32.mrf.mxu0 }
 0x1d8   : > { %v3337_v62 = vmax.f32 %v3305_v56, 0.0  ;;  %v3269_v49 = vadd.f32 %v4647_v47, %v3029_v1  ;;  %v3027_v5 = vadd.f32 %v2936_v39, %v6248_v58  ;;  %v3303_v33 = vadd.f32 %v6320_v57, %v3264_v10 }
 0x1d9   : > { %v4608_v24 = vpop.f32.mrf.mxu1  ;;  %v4648_v26 = vpop.f32.mrf.mxu0  ;;  %v2341_v58 = vadd.f32 %v6258_v11, %v6157_v30 }
 0x1da   : > { %v4058_v15 = vpack.c.bf16 %v3337_v62, %v3336_v36  ;;  %v3267_v37 = vadd.f32 %v3176_v38, %v3027_v5  ;;  %v3030_v2 = vadd.f32 %v4608_v24, %v2790_v55  ;;  %v3335_v21 = vmax.f32 %v3303_v33, 0.0  ;;  %v6504_v33 = vld [vmem:[#allocation5_spill] sm:$0xff] }
 0x1db   : > { %v2939_v61 = vpop.f32.mrf.mxu1  ;;  %v3179_v3 = vpop.f32.mrf.mxu0  ;;  %v3308_v59 = vadd.f32 %v6320_v57, %v3269_v49  ;;  %v2794_v11 = vadd.f32 %v6260_v54, %v2341_v58  ;;  %v2345_v55 = vadd.f32 %v6272_v23, %v6169_v19  ;;  %v2343_v49 = vadd.f32 %v6278_v34, %v6172_v25  ;;  %v6506_v34 = vld [vmem:[#allocation7_spill] sm:$0xff] }
 0x1dc   : > { %4114 = vst [vmem:[%s6339_s15 + $0x28] sm:$0xff] %v4058_v15   ;;  %v3270_v22 = vadd.f32 %v4648_v26, %v3030_v2  ;;  %v3028_v18 = vadd.f32 %v2939_v61, %v2788_v35  ;;  %v4053_v14 = vpack.c.bf16 %v3335_v21, %v3334_v60  ;;  %v3306_v0 = vadd.f32 %v6320_v57, %v3267_v37  ;;  %v6505_v15 = vld [vmem:[#allocation6_spill] sm:$0xff] }
 0x1dd   : > { %v4611_v28 = vpop.f32.mrf.mxu1  ;;  %v4651_v41 = vpop.f32.mrf.mxu0  ;;  %v3340_v53 = vmax.f32 %v3308_v59, 0.0  ;;  %v2798_v24 = vadd.f32 %v6504_v33, %v2345_v55  ;;  %v2796_v59 = vadd.f32 %v6506_v34, %v2343_v49  ;;  %v6512_v49 = vld [vmem:[#allocation9_spill] sm:$0xff]  ;;  %v6516_v34 = vld [vmem:[#allocation12_spill] sm:$0xff] }
 0x1de   : > { %v3309_v27 = vadd.f32 %v6320_v57, %v3270_v22  ;;  %v3268_v46 = vadd.f32 %v3179_v3, %v3028_v18  ;;  %v3033_v31 = vadd.f32 %v4611_v28, %v6255_v4  ;;  %4113 = vst [vmem:[%s6339_s15 + $0x20] sm:$0xff] %v4053_v14   ;;  %v3338_v32 = vmax.f32 %v3306_v0, 0.0  ;;  %v6507_v22 = vld [vmem:[#allocation2_spill] sm:$0xff] }
 0x1df   : > { %v2952_v29 = vpop.f32.mrf.mxu1  ;;  %v3192_v17 = vpop.f32.mrf.mxu0  ;;  %v2349_v18 = vadd.f32 %v6286_v51, %v6507_v22  ;;  %v6517_v22 = vld [vmem:[#allocation15_spill] sm:$0xff] }
 0x1e0   : > { %v3341_v40 = vmax.f32 %v3309_v27, 0.0  ;;  %v3307_v30 = vadd.f32 %v6320_v57, %v3268_v46  ;;  %v3031_v45 = vadd.f32 %v2952_v29, %v6262_v7  ;;  %v3273_v43 = vadd.f32 %v4651_v41, %v3033_v31 }
 0x1e1   : > { %v4612_v50 = vpop.f32.mrf.mxu1  ;;  %v4652_v63 = vpop.f32.mrf.mxu0 }
 0x1e2   : > { %v4068_v4 = vpack.c.bf16 %v3341_v40, %v3340_v53  ;;  %v3339_v52 = vmax.f32 %v3307_v30, 0.0  ;;  %v3271_v47 = vadd.f32 %v3192_v17, %v3031_v45  ;;  %v3034_v48 = vadd.f32 %v4612_v50, %v2794_v11  ;;  %v6508_v17 = vld [vmem:[#allocation3_spill] sm:$0xff] }
 0x1e3   : > { %v2955_v56 = vpop.f32.mrf.mxu1  ;;  %v3195_v1 = vpop.f32.mrf.mxu0  ;;  %v3312_v54 = vadd.f32 %v6320_v57, %v3273_v43  ;;  %v2347_v53 = vadd.f32 %v6292_v44, %v6508_v17  ;;  %v2802_v30 = vadd.f32 %v6288_v12, %v2349_v18 }
 0x1e4   : > { %4116 = vst [vmem:[%s6339_s15 + $0x38] sm:$0xff] %v4068_v4   ;;  %v4063_v7 = vpack.c.bf16 %v3339_v52, %v3338_v32  ;;  %v3032_v9 = vadd.f32 %v2955_v56, %v2792_v13  ;;  %v3274_v16 = vadd.f32 %v4652_v63, %v3034_v48  ;;  %v3310_v38 = vadd.f32 %v6320_v57, %v3271_v47  ;;  %v6509_v4 = vld [vmem:[#allocation8_spill] sm:$0xff]  ;;  %v6510_v56 = vld [vmem:[#allocation10_spill] sm:$0xff] }
 0x1e5   : > { %v4615_v10 = vpop.f32.mrf.mxu1  ;;  %v4655_v39 = vpop.f32.mrf.mxu0  ;;  %v3344_v2 = vmax.f32 %v3312_v54, 0.0 }
 0x1e6   : > { %4115 = vst [vmem:[%s6339_s15 + $0x30] sm:$0xff] %v4063_v7   ;;  %v3272_v36 = vadd.f32 %v3195_v1, %v3032_v9  ;;  %v3037_v62 = vadd.f32 %v4615_v10, %v6269_v20  ;;  %v3313_v5 = vadd.f32 %v6320_v57, %v3274_v16  ;;  %v3342_v20 = vmax.f32 %v3310_v38, 0.0 }
 0x1e7   : > { %v2968_v19 = vpop.f32.mrf.mxu1  ;;  %v3208_v23 = vpop.f32.mrf.mxu0  ;;  %v2800_v1 = vadd.f32 %v6510_v56, %v2347_v53 }
 0x1e8   : > { %v3311_v26 = vadd.f32 %v6320_v57, %v3272_v36  ;;  %v3277_v35 = vadd.f32 %v4655_v39, %v3037_v62  ;;  %v3035_v37 = vadd.f32 %v2968_v19, %v6505_v15  ;;  %v3345_v60 = vmax.f32 %v3313_v5, 0.0  ;;  %v6511_v36 = vld [vmem:[#allocation4_spill] sm:$0xff]  ;;  %v6513_v5 = vld [vmem:[#allocation14_spill] sm:$0xff] }
 0x1e9   : > { %v4616_v21 = vpop.f32.mrf.mxu1  ;;  %v4656_v61 = vpop.f32.mrf.mxu0  ;;  %v2353_v62 = vadd.f32 %v6300_v8, %v6511_v36  ;;  %v2351_v19 = vadd.f32 %v6513_v5, %v6512_v49 }
 0x1ea   : > { %v3343_v3 = vmax.f32 %v3311_v26, 0.0  ;;  %v3038_v25 = vadd.f32 %v4616_v21, %v2798_v24  ;;  %v4078_v58 = vpack.c.bf16 %v3345_v60, %v3344_v2  ;;  %v3275_v6 = vadd.f32 %v3208_v23, %v3035_v37  ;;  %v6514_v37 = vld [vmem:[#allocation11_spill] sm:$0xff] }
 0x1eb   : > { %v2971_v14 = vpop.f32.mrf.mxu1  ;;  %v3211_v28 = vpop.f32.mrf.mxu0  ;;  %v3316_v0 = vadd.f32 %v6320_v57, %v3277_v35  ;;  %v2804_v18 = vadd.f32 %v6517_v22, %v2351_v19 }
 0x1ec   : > { %v4073_v41 = vpack.c.bf16 %v3343_v3, %v3342_v20  ;;  %v3278_v27 = vadd.f32 %v4656_v61, %v3038_v25  ;;  %4118 = vst [vmem:[%s6339_s15 + $0x48] sm:$0xff] %v4078_v58   ;;  %v3036_v46 = vadd.f32 %v2971_v14, %v2796_v59  ;;  %v3314_v45 = vadd.f32 %v6320_v57, %v3275_v6  ;;  %v6515_v3 = vld [vmem:[#allocation13_spill] sm:$0xff] }
 0x1ed   : > { %v4619_v31 = vpop.f32.mrf.mxu1  ;;  %v4659_v29 = vpop.f32.mrf.mxu0  ;;  %v3348_v50 = vmax.f32 %v3316_v0, 0.0  ;;  %v2806_v59 = vadd.f32 %v6516_v34, %v2353_v62 }
 0x1ee   : > { %4117 = vst [vmem:[%s6339_s15 + $0x40] sm:$0xff] %v4073_v41   ;;  %v3317_v40 = vadd.f32 %v6320_v57, %v3278_v27  ;;  %v3041_v51 = vadd.f32 %v4619_v31, %v6283_v42  ;;  %v3276_v11 = vadd.f32 %v3211_v28, %v3036_v46  ;;  %v3346_v7 = vmax.f32 %v3314_v45, 0.0 }
 0x1ef   : > { %v2984_v13 = vpop.f32.mrf.mxu1  ;;  %v3224_v43 = vpop.f32.mrf.mxu0 }
 0x1f0   : > { %v3349_v63 = vmax.f32 %v3317_v40, 0.0  ;;  %v3281_v32 = vadd.f32 %v4659_v29, %v3041_v51  ;;  %v3039_v52 = vadd.f32 %v2984_v13, %v6509_v4  ;;  %v3315_v44 = vadd.f32 %v6320_v57, %v3276_v11 }
 0x1f1   : > { %v4620_v47 = vpop.f32.mrf.mxu1  ;;  %v4660_v48 = vpop.f32.mrf.mxu0 }
 0x1f2   : > { %v4088_v42 = vpack.c.bf16 %v3349_v63, %v3348_v50  ;;  %v3279_v55 = vadd.f32 %v3224_v43, %v3039_v52  ;;  %v3042_v12 = vadd.f32 %v4620_v47, %v2802_v30  ;;  %v3347_v9 = vmax.f32 %v3315_v44, 0.0 }
 0x1f3   : > { %v2987_v54 = vpop.f32.mrf.mxu1  ;;  %v3227_v16 = vpop.f32.mrf.mxu0  ;;  %v3320_v10 = vadd.f32 %v6320_v57, %v3281_v32 }
 0x1f4   : > { %4120 = vst [vmem:[%s6339_s15 + $0x58] sm:$0xff] %v4088_v42   ;;  %v3282_v39 = vadd.f32 %v4660_v48, %v3042_v12  ;;  %v3040_v38 = vadd.f32 %v2987_v54, %v2800_v1  ;;  %v4083_v23 = vpack.c.bf16 %v3347_v9, %v3346_v7  ;;  %v3318_v26 = vadd.f32 %v6320_v57, %v3279_v55 }
 0x1f5   : > { %v4623_v33 = vpop.f32.mrf.mxu1  ;;  %v4663_v24 = vpop.f32.mrf.mxu0  ;;  %v3352_v61 = vmax.f32 %v3320_v10, 0.0 }
 0x1f6   : > { %v3321_v35 = vadd.f32 %v6320_v57, %v3282_v39  ;;  %v3280_v15 = vadd.f32 %v3227_v16, %v3040_v38  ;;  %v3045_v2 = vadd.f32 %v4623_v33, %v6514_v37  ;;  %4119 = vst [vmem:[%s6339_s15 + $0x50] sm:$0xff] %v4083_v23   ;;  %v3350_v28 = vmax.f32 %v3318_v26, 0.0 }
 0x1f7   : > { %v3000_v60 = vpop.f32.mrf.mxu1  ;;  %v3240_v21 = vpop.f32.mrf.mxu0 }
 0x1f8   : > { %v3353_v20 = vmax.f32 %v3321_v35, 0.0  ;;  %v3319_v8 = vadd.f32 %v6320_v57, %v3280_v15  ;;  %v3043_v25 = vadd.f32 %v3000_v60, %v6515_v3  ;;  %v3285_v58 = vadd.f32 %v4663_v24, %v3045_v2 }
 0x1f9   : > { %v4624_v6 = vpop.f32.mrf.mxu1  ;;  %v4664_v14 = vpop.f32.mrf.mxu0 }
 0x1fa   : > { %v4098_v41 = vpack.c.bf16 %v3353_v20, %v3352_v61  ;;  %v3351_v0 = vmax.f32 %v3319_v8, 0.0  ;;  %v3283_v27 = vadd.f32 %v3240_v21, %v3043_v25  ;;  %v3046_v46 = vadd.f32 %v4624_v6, %v2806_v59 }
 0x1fb   : > { %v3003_v31 = vpop.f32.mrf.mxu1  ;;  %v3324_v53 = vadd.f32 %v6320_v57, %v3285_v58  ;;  %v3243_v51 = vpop.f32.mrf.mxu0 }
 0x1fc   : > { %4122 = vst [vmem:[%s6339_s15 + $0x68] sm:$0xff] %v4098_v41   ;;  %v4093_v29 = vpack.c.bf16 %v3351_v0, %v3350_v28  ;;  %v3044_v17 = vadd.f32 %v3003_v31, %v2804_v18  ;;  %v3286_v40 = vadd.f32 %v4664_v14, %v3046_v46  ;;  %v3322_v30 = vadd.f32 %v6320_v57, %v3283_v27 }
 0x1fd   : > { %v3356_v43 = vmax.f32 %v3324_v53, 0.0 }
 0x1fe   : > { %4121 = vst [vmem:[%s6339_s15 + $0x60] sm:$0xff] %v4093_v29   ;;  %v3284_v45 = vadd.f32 %v3243_v51, %v3044_v17  ;;  %v3325_v11 = vadd.f32 %v6320_v57, %v3286_v40  ;;  %v3354_v63 = vmax.f32 %v3322_v30, 0.0 }
 0x200   : > { %v3323_v13 = vadd.f32 %v6320_v57, %v3284_v45  ;;  %v3357_v50 = vmax.f32 %v3325_v11, 0.0 }
 0x202   : > { %v3355_v32 = vmax.f32 %v3323_v13, 0.0  ;;  %v4108_v4 = vpack.c.bf16 %v3357_v50, %v3356_v43 }
 0x204   : > { %v4103_v52 = vpack.c.bf16 %v3355_v32, %v3354_v63  ;;  %4124 = vst [vmem:[%s6339_s15 + $0x78] sm:$0xff] %v4108_v4  }
 0x206   : > { %4123 = vst [vmem:[%s6339_s15 + $0x70] sm:$0xff] %v4103_v52  }
 0x207 PF: > { %s14_s17 = sadd.s32 1, %s4804_s17   ;;  %s6518_s15 = smov %s4800_s16 }
 0x208   : > { %p11_p5 = scmp.ge.s32.totalorder %s14_s17, 4   ;;  %s6519_s16 = smov %s6521_s18 }
 0x20a   :  { %13 = sbr.rel (!%p11_p5) target bundleno = 2 (0x2), region = 77 }

</bundles_post_ra>
